<compile_context>
chip_gen: v6e
topology: v6e:2x2x1
jax: 0.10.0
libtpu: 0.0.40
codegen_flags: <defaults>
</compile_context>

<pallas_src>
import math

import jax
import jax.numpy as jnp
from jax import lax
from jax.experimental import pallas as pl
from jax.experimental.pallas import tpu as pltpu


def make_attention_kernel(bblk, t, e, heads, mm_dtype):
    s = e // heads
    rows = bblk * t
    # Batched (over the Bblk batch elements in the block) Q K^T without
    # materializing a transpose: contract the trailing s axis of both operands.
    qk_dims = (((2,), (2,)), ((0,), (0,)))   # (bblk,t,s) x (bblk,t,s) -> (bblk,t,t)
    pv_dims = (((2,), (1,)), ((0,), (0,)))   # (bblk,t,t) x (bblk,t,s) -> (bblk,t,s)

    def kernel(x_ref, wkT_ref, wqT_ref, wvT_ref, wuT_ref, bu_ref, o_ref):
        x = x_ref[...].reshape(rows, e)        # leading-dim merge (free), bf16
        wkT = wkT_ref[...]                     # (e, e)  == Wk^T             (bf16)
        wqT = wqT_ref[...]                     # (e, e)  == (scale * Wq)^T   (bf16)
        wvT = wvT_ref[...]                     # (e, e)  == Wv^T             (bf16)

        # Projections: bf16 MXU inputs, f32 accumulation, re-narrowed to bf16
        # for the attention matmuls.
        k = jnp.dot(x, wkT, preferred_element_type=jnp.float32).astype(mm_dtype)
        q = jnp.dot(x, wqT, preferred_element_type=jnp.float32).astype(mm_dtype)
        v = jnp.dot(x, wvT, preferred_element_type=jnp.float32).astype(mm_dtype)

        # Per-head attention. unifyheads is accumulated per head so every store
        # stays full-lane-width (rows, e); no (t, s) lane-slice stores.
        acc = None
        for h in range(heads):
            lo = h * s
            qh = q[:, lo:lo + s].reshape(bblk, t, s)
            kh = k[:, lo:lo + s].reshape(bblk, t, s)
            vh = v[:, lo:lo + s].reshape(bblk, t, s)

            logits = lax.dot_general(qh, kh, qk_dims,
                                     preferred_element_type=jnp.float32)   # f32
            logits = logits - jnp.max(logits, axis=-1, keepdims=True)
            p = jnp.exp(logits)                                            # f32 softmax
            inv = pl.reciprocal(jnp.sum(p, axis=-1, keepdims=True), approx=True)
            p = (p * inv).astype(mm_dtype)

            oh = lax.dot_general(p, vh, pv_dims,
                                 preferred_element_type=jnp.float32)       # (bblk,t,s)
            oh = oh.reshape(rows, s).astype(mm_dtype)

            # unifyheads partial: (rows, s) @ (s, e) -> full-width (rows, e).
            part = jnp.dot(oh, wuT_ref[lo:lo + s, :],
                           preferred_element_type=jnp.float32)
            acc = part if acc is None else acc + part

        out = acc + bu_ref[...]                                            # f32 bias add
        o_ref[...] = out.reshape(bblk, t, e).astype(o_ref.dtype)

    return kernel


def self_attention_sparse(x, wk, wq, wv, wu, bu, *, heads, scalefactor=None,
                          mm_dtype=jnp.bfloat16):
    b, t, e = x.shape
    assert e % heads == 0, (e, heads)
    s = e // heads
    scale = (1.0 / math.sqrt(s)) if scalefactor is None else scalefactor
    out_dtype = x.dtype

    # Hoist all transposes into the wrapper (one-time XLA ops) and fold the
    # attention scale into the query projection BEFORE the bf16 cast:
    #   x @ (scale*Wq)^T == scale * (x @ Wq^T).
    wkT = wk.T.astype(mm_dtype)
    wqT = (scale * wq).T.astype(mm_dtype)
    wvT = wv.T.astype(mm_dtype)
    wuT = wu.T.astype(mm_dtype)
    bu2 = bu.reshape(1, e).astype(jnp.float32)   # bias added post-accumulation, f32
    x_in = x.astype(mm_dtype)                    # bf16 HBM copy -> bf16 DMA

    # Batch-block the grid so projection / unifyheads matmuls see Bblk*t rows
    # per step (fills the 128/256-row MXU and amortizes per-step overhead).
    row_target = 512
    bblk = 1
    for d in range(b, 0, -1):
        if b % d == 0 and d * t <= max(row_target, t):
            bblk = d
            break
    grid = (b // bblk,)
    rows = bblk * t

    itemsize = jnp.dtype(mm_dtype).itemsize
    weight_bytes = 4 * e * e * itemsize

    # Constant-index weight blocks: once the pipeline's second copy costs real
    # VMEM, request single buffering (critical on v7x's 64 MiB VMEM).
    if weight_bytes >= (4 << 20):
        w_spec = pl.BlockSpec((e, e), lambda i: (0, 0),
                              pipeline_mode=pl.Buffered(1))
        resident_weight_bytes = weight_bytes
    else:
        w_spec = pl.BlockSpec((e, e), lambda i: (0, 0))
        resident_weight_bytes = 2 * weight_bytes

    # Rough VMEM budget; only raise the scoped limit when the 32 MiB default
    # would be exceeded (keeps the small-config path untouched).
    est_vmem = (
        resident_weight_bytes
        + 2 * rows * e * itemsize                        # x tiles (double-buffered)
        + 2 * rows * e * jnp.dtype(out_dtype).itemsize   # out tiles (double-buffered)
        + 3 * rows * e * (4 + itemsize)                  # k/q/v f32 results + bf16 copies
        + 2 * bblk * t * t * 4                           # logits + softmax temporaries
        + 2 * rows * e * 4                               # unifyheads accumulator + slack
    )
    vmem_limit = None
    if est_vmem > (32 << 20):
        vmem_limit = min(int(est_vmem * 5 // 4), 128 << 20)

    kernel = make_attention_kernel(bblk, t, e, heads, mm_dtype)

    return pl.pallas_call(
        kernel,
        out_shape=jax.ShapeDtypeStruct((b, t, e), out_dtype),
        grid_spec=pltpu.PrefetchScalarGridSpec(
            num_scalar_prefetch=0,
            grid=grid,
            in_specs=[
                pl.BlockSpec((bblk, t, e), lambda i: (i, 0, 0)),   # x (bf16)
                w_spec,                                            # Wk^T
                w_spec,                                            # (scale*Wq)^T
                w_spec,                                            # Wv^T
                w_spec,                                            # Wu^T
                pl.BlockSpec((1, e), lambda i: (0, 0)),            # unifyheads bias
            ],
            out_specs=pl.BlockSpec((bblk, t, e), lambda i: (i, 0, 0)),
        ),
        compiler_params=pltpu.CompilerParams(
            dimension_semantics=("parallel",),
            vmem_limit_bytes=vmem_limit),
    )(x_in, wkT, wqT, wvT, wuT, bu2)


def reference(x, wk, wq, wv, wu, bu, *, heads, scalefactor=None):
    """Pure-JAX f32 reference mirroring the PyTorch forward (mask/kqnorm off)."""
    b, t, e = x.shape
    s = e // heads
    scale = (1.0 / math.sqrt(s)) if scalefactor is None else scalefactor
    k = x @ wk.T
    q = x @ wq.T
    v = x @ wv.T

    def split(z):  # (b, t, e) -> (b, h, t, s)
        return z.reshape(b, t, heads, s).transpose(0, 2, 1, 3)

    q, k, v = split(q), split(k), split(v)
    dot = jnp.einsum('bhts,bhus->bhtu', q, k) * scale
    p = jax.nn.softmax(dot, axis=-1)
    out = jnp.einsum('bhtu,bhus->bhts', p, v)
    out = out.transpose(0, 2, 1, 3).reshape(b, t, e)
    return out @ wu.T + bu


if __name__ == "__main__":
    b, t, e, heads = 2, 8, 32, 8

    key = jax.random.PRNGKey(0)
    kx, kk, kq, kv, ku, kb = jax.random.split(key, 6)

    x = jax.random.normal(kx, (b, t, e), dtype=jnp.float32)

    # Sparse COO weights materialized densely: upper-tri for keys, lower-tri
    # for queries, values ~ N(0, 0.02) as in the module __init__.
    wk = jnp.triu(0.02 * jax.random.normal(kk, (e, e), dtype=jnp.float32))
    wq = jnp.tril(0.02 * jax.random.normal(kq, (e, e), dtype=jnp.float32))

    # nn.Linear-style init for tovalues / unifyheads.
    bound = 1.0 / math.sqrt(e)
    wv = jax.random.uniform(kv, (e, e), jnp.float32, -bound, bound)
    wu = jax.random.uniform(ku, (e, e), jnp.float32, -bound, bound)
    bu = jax.random.uniform(kb, (e,), jnp.float32, -bound, bound)

    out = self_attention_sparse(x, wk, wq, wv, wu, bu, heads=heads)
    out = jax.block_until_ready(out)

    ref = reference(x, wk, wq, wv, wu, bu, heads=heads)
    assert out.shape == (b, t, e)
    # Tolerance covers bf16 MXU inputs (f32 accumulation throughout) and the
    # EUP approximate reciprocal in the kernel softmax vs. the pure-f32 reference.
    max_err = float(jnp.max(jnp.abs(out - ref)))
    assert jnp.allclose(out, ref, rtol=3e-2, atol=3e-2), max_err

    print("KERNEL_OK")
</pallas_src>

<mosaic_0001>
module attributes {stable_mosaic.version = 11 : i64} {
  func.func @kernel(%arg0: i32, %arg1: memref<2x8x32xbf16, #tpu.memory_space<vmem>>, %arg2: memref<32x32xbf16, #tpu.memory_space<vmem>>, %arg3: memref<32x32xbf16, #tpu.memory_space<vmem>>, %arg4: memref<32x32xbf16, #tpu.memory_space<vmem>>, %arg5: memref<32x32xbf16, #tpu.memory_space<vmem>>, %arg6: memref<1x32xf32, #tpu.memory_space<vmem>>, %arg7: memref<2x8x32xf32, #tpu.memory_space<vmem>>) attributes {dimension_semantics = [#tpu.dimension_semantics<parallel>], iteration_bounds = array<i64: 1>, scalar_prefetch = 0 : i64, scratch_operands = 0 : i64, tpu.core_type = #tpu.core_type<tc>, window_params = [{transform_indices = @transform_0, window_bounds = array<i64: 2, 8, 32>}, {pipeline_mode = #tpu.pipeline_mode<synchronous>, transform_indices = @transform_1, window_bounds = array<i64: 32, 32>}, {pipeline_mode = #tpu.pipeline_mode<synchronous>, transform_indices = @transform_2, window_bounds = array<i64: 32, 32>}, {pipeline_mode = #tpu.pipeline_mode<synchronous>, transform_indices = @transform_3, window_bounds = array<i64: 32, 32>}, {pipeline_mode = #tpu.pipeline_mode<synchronous>, transform_indices = @transform_4, window_bounds = array<i64: 32, 32>}, {pipeline_mode = #tpu.pipeline_mode<synchronous>, transform_indices = @transform_5, window_bounds = array<i64: 1, 32>}, {transform_indices = @transform_6, window_bounds = array<i64: 2, 8, 32>}]} {
    %c0 = arith.constant 0 : index
    %c0_0 = arith.constant 0 : index
    %c0_1 = arith.constant 0 : index
    %0 = vector.load %arg1[%c0, %c0_0, %c0_1] : memref<2x8x32xbf16, #tpu.memory_space<vmem>>, vector<2x8x32xbf16>
    %1 = vector.shape_cast %0 : vector<2x8x32xbf16> to vector<16x32xbf16>
    %c0_2 = arith.constant 0 : index
    %c0_3 = arith.constant 0 : index
    %2 = vector.load %arg2[%c0_2, %c0_3] : memref<32x32xbf16, #tpu.memory_space<vmem>>, vector<32x32xbf16>
    %c0_4 = arith.constant 0 : index
    %c0_5 = arith.constant 0 : index
    %3 = vector.load %arg3[%c0_4, %c0_5] : memref<32x32xbf16, #tpu.memory_space<vmem>>, vector<32x32xbf16>
    %c0_6 = arith.constant 0 : index
    %c0_7 = arith.constant 0 : index
    %4 = vector.load %arg4[%c0_6, %c0_7] : memref<32x32xbf16, #tpu.memory_space<vmem>>, vector<32x32xbf16>
    %cst = arith.constant dense<0.000000e+00> : vector<16x32xf32>
    %5 = tpu.matmul %1, %2, %cst {dimension_numbers = #tpu.dot_dimension_numbers<[1], [0], [0], [1], [0, 0, 1, 1], [], []>} : vector<16x32xbf16>, vector<32x32xbf16>, vector<16x32xf32> -> vector<16x32xf32>
    %6 = arith.truncf %5 : vector<16x32xf32> to vector<16x32xbf16>
    %cst_8 = arith.constant dense<0.000000e+00> : vector<16x32xf32>
    %7 = tpu.matmul %1, %3, %cst_8 {dimension_numbers = #tpu.dot_dimension_numbers<[1], [0], [0], [1], [0, 0, 1, 1], [], []>} : vector<16x32xbf16>, vector<32x32xbf16>, vector<16x32xf32> -> vector<16x32xf32>
    %8 = arith.truncf %7 : vector<16x32xf32> to vector<16x32xbf16>
    %cst_9 = arith.constant dense<0.000000e+00> : vector<16x32xf32>
    %9 = tpu.matmul %1, %4, %cst_9 {dimension_numbers = #tpu.dot_dimension_numbers<[1], [0], [0], [1], [0, 0, 1, 1], [], []>} : vector<16x32xbf16>, vector<32x32xbf16>, vector<16x32xf32> -> vector<16x32xf32>
    %10 = arith.truncf %9 : vector<16x32xf32> to vector<16x32xbf16>
    %11 = vector.extract_strided_slice %8 {offsets = [0, 0], sizes = [16, 4], strides = [1, 1]} : vector<16x32xbf16> to vector<16x4xbf16>
    %12 = vector.shape_cast %11 : vector<16x4xbf16> to vector<2x8x4xbf16>
    %13 = vector.extract_strided_slice %6 {offsets = [0, 0], sizes = [16, 4], strides = [1, 1]} : vector<16x32xbf16> to vector<16x4xbf16>
    %14 = vector.shape_cast %13 : vector<16x4xbf16> to vector<2x8x4xbf16>
    %15 = vector.extract_strided_slice %10 {offsets = [0, 0], sizes = [16, 4], strides = [1, 1]} : vector<16x32xbf16> to vector<16x4xbf16>
    %16 = vector.shape_cast %15 : vector<16x4xbf16> to vector<2x8x4xbf16>
    %cst_10 = arith.constant dense<0.000000e+00> : vector<2x8x8xf32>
    %17 = tpu.matmul %12, %14, %cst_10 {dimension_numbers = #tpu.dot_dimension_numbers<[2], [2], [1], [1], [0, 0, 0, 1, 1, 1], [0], [0]>} : vector<2x8x4xbf16>, vector<2x8x4xbf16>, vector<2x8x8xf32> -> vector<2x8x8xf32>
    %cst_11 = arith.constant dense<0xFF800000> : vector<2x8xf32>
    %18 = vector.multi_reduction <maximumf>, %17, %cst_11 [2] : vector<2x8x8xf32> to vector<2x8xf32>
    %19 = vector.shape_cast %18 : vector<2x8xf32> to vector<2x8x1xf32>
    %20 = vector.broadcast %19 : vector<2x8x1xf32> to vector<2x8x8xf32>
    %21 = arith.subf %17, %20 : vector<2x8x8xf32>
    %22 = math.exp %21 : vector<2x8x8xf32>
    %cst_12 = arith.constant dense<0.000000e+00> : vector<2x8xf32>
    %23 = vector.multi_reduction <add>, %22, %cst_12 [2] : vector<2x8x8xf32> to vector<2x8xf32>
    %24 = vector.shape_cast %23 : vector<2x8xf32> to vector<2x8x1xf32>
    %25 = tpu.reciprocal %24 {approx = true} : vector<2x8x1xf32> -> vector<2x8x1xf32>
    %26 = vector.broadcast %25 : vector<2x8x1xf32> to vector<2x8x8xf32>
    %27 = arith.mulf %22, %26 : vector<2x8x8xf32>
    %28 = arith.truncf %27 : vector<2x8x8xf32> to vector<2x8x8xbf16>
    %cst_13 = arith.constant dense<0.000000e+00> : vector<2x8x4xf32>
    %29 = tpu.matmul %28, %16, %cst_13 {dimension_numbers = #tpu.dot_dimension_numbers<[2], [1], [1], [2], [0, 0, 0, 1, 1, 2], [0], [0]>} : vector<2x8x8xbf16>, vector<2x8x4xbf16>, vector<2x8x4xf32> -> vector<2x8x4xf32>
    %30 = vector.shape_cast %29 : vector<2x8x4xf32> to vector<16x4xf32>
    %31 = arith.truncf %30 : vector<16x4xf32> to vector<16x4xbf16>
    %c0_14 = arith.constant 0 : index
    %c0_15 = arith.constant 0 : index
    %32 = vector.load %arg5[%c0_14, %c0_15] : memref<32x32xbf16, #tpu.memory_space<vmem>>, vector<4x32xbf16>
    %cst_16 = arith.constant dense<0.000000e+00> : vector<16x32xf32>
    %33 = tpu.matmul %31, %32, %cst_16 {dimension_numbers = #tpu.dot_dimension_numbers<[1], [0], [0], [1], [0, 0, 1, 1], [], []>} : vector<16x4xbf16>, vector<4x32xbf16>, vector<16x32xf32> -> vector<16x32xf32>
    %34 = vector.extract_strided_slice %8 {offsets = [0, 4], sizes = [16, 4], strides = [1, 1]} : vector<16x32xbf16> to vector<16x4xbf16>
    %35 = vector.shape_cast %34 : vector<16x4xbf16> to vector<2x8x4xbf16>
    %36 = vector.extract_strided_slice %6 {offsets = [0, 4], sizes = [16, 4], strides = [1, 1]} : vector<16x32xbf16> to vector<16x4xbf16>
    %37 = vector.shape_cast %36 : vector<16x4xbf16> to vector<2x8x4xbf16>
    %38 = vector.extract_strided_slice %10 {offsets = [0, 4], sizes = [16, 4], strides = [1, 1]} : vector<16x32xbf16> to vector<16x4xbf16>
    %39 = vector.shape_cast %38 : vector<16x4xbf16> to vector<2x8x4xbf16>
    %cst_17 = arith.constant dense<0.000000e+00> : vector<2x8x8xf32>
    %40 = tpu.matmul %35, %37, %cst_17 {dimension_numbers = #tpu.dot_dimension_numbers<[2], [2], [1], [1], [0, 0, 0, 1, 1, 1], [0], [0]>} : vector<2x8x4xbf16>, vector<2x8x4xbf16>, vector<2x8x8xf32> -> vector<2x8x8xf32>
    %cst_18 = arith.constant dense<0xFF800000> : vector<2x8xf32>
    %41 = vector.multi_reduction <maximumf>, %40, %cst_18 [2] : vector<2x8x8xf32> to vector<2x8xf32>
    %42 = vector.shape_cast %41 : vector<2x8xf32> to vector<2x8x1xf32>
    %43 = vector.broadcast %42 : vector<2x8x1xf32> to vector<2x8x8xf32>
    %44 = arith.subf %40, %43 : vector<2x8x8xf32>
    %45 = math.exp %44 : vector<2x8x8xf32>
    %cst_19 = arith.constant dense<0.000000e+00> : vector<2x8xf32>
    %46 = vector.multi_reduction <add>, %45, %cst_19 [2] : vector<2x8x8xf32> to vector<2x8xf32>
    %47 = vector.shape_cast %46 : vector<2x8xf32> to vector<2x8x1xf32>
    %48 = tpu.reciprocal %47 {approx = true} : vector<2x8x1xf32> -> vector<2x8x1xf32>
    %49 = vector.broadcast %48 : vector<2x8x1xf32> to vector<2x8x8xf32>
    %50 = arith.mulf %45, %49 : vector<2x8x8xf32>
    %51 = arith.truncf %50 : vector<2x8x8xf32> to vector<2x8x8xbf16>
    %cst_20 = arith.constant dense<0.000000e+00> : vector<2x8x4xf32>
    %52 = tpu.matmul %51, %39, %cst_20 {dimension_numbers = #tpu.dot_dimension_numbers<[2], [1], [1], [2], [0, 0, 0, 1, 1, 2], [0], [0]>} : vector<2x8x8xbf16>, vector<2x8x4xbf16>, vector<2x8x4xf32> -> vector<2x8x4xf32>
    %53 = vector.shape_cast %52 : vector<2x8x4xf32> to vector<16x4xf32>
    %54 = arith.truncf %53 : vector<16x4xf32> to vector<16x4xbf16>
    %c4 = arith.constant 4 : index
    %c0_21 = arith.constant 0 : index
    %55 = vector.load %arg5[%c4, %c0_21] : memref<32x32xbf16, #tpu.memory_space<vmem>>, vector<4x32xbf16>
    %cst_22 = arith.constant dense<0.000000e+00> : vector<16x32xf32>
    %56 = tpu.matmul %54, %55, %cst_22 {dimension_numbers = #tpu.dot_dimension_numbers<[1], [0], [0], [1], [0, 0, 1, 1], [], []>} : vector<16x4xbf16>, vector<4x32xbf16>, vector<16x32xf32> -> vector<16x32xf32>
    %57 = arith.addf %33, %56 : vector<16x32xf32>
    %58 = vector.extract_strided_slice %8 {offsets = [0, 8], sizes = [16, 4], strides = [1, 1]} : vector<16x32xbf16> to vector<16x4xbf16>
    %59 = vector.shape_cast %58 : vector<16x4xbf16> to vector<2x8x4xbf16>
    %60 = vector.extract_strided_slice %6 {offsets = [0, 8], sizes = [16, 4], strides = [1, 1]} : vector<16x32xbf16> to vector<16x4xbf16>
    %61 = vector.shape_cast %60 : vector<16x4xbf16> to vector<2x8x4xbf16>
    %62 = vector.extract_strided_slice %10 {offsets = [0, 8], sizes = [16, 4], strides = [1, 1]} : vector<16x32xbf16> to vector<16x4xbf16>
    %63 = vector.shape_cast %62 : vector<16x4xbf16> to vector<2x8x4xbf16>
    %cst_23 = arith.constant dense<0.000000e+00> : vector<2x8x8xf32>
    %64 = tpu.matmul %59, %61, %cst_23 {dimension_numbers = #tpu.dot_dimension_numbers<[2], [2], [1], [1], [0, 0, 0, 1, 1, 1], [0], [0]>} : vector<2x8x4xbf16>, vector<2x8x4xbf16>, vector<2x8x8xf32> -> vector<2x8x8xf32>
    %cst_24 = arith.constant dense<0xFF800000> : vector<2x8xf32>
    %65 = vector.multi_reduction <maximumf>, %64, %cst_24 [2] : vector<2x8x8xf32> to vector<2x8xf32>
    %66 = vector.shape_cast %65 : vector<2x8xf32> to vector<2x8x1xf32>
    %67 = vector.broadcast %66 : vector<2x8x1xf32> to vector<2x8x8xf32>
    %68 = arith.subf %64, %67 : vector<2x8x8xf32>
    %69 = math.exp %68 : vector<2x8x8xf32>
    %cst_25 = arith.constant dense<0.000000e+00> : vector<2x8xf32>
    %70 = vector.multi_reduction <add>, %69, %cst_25 [2] : vector<2x8x8xf32> to vector<2x8xf32>
    %71 = vector.shape_cast %70 : vector<2x8xf32> to vector<2x8x1xf32>
    %72 = tpu.reciprocal %71 {approx = true} : vector<2x8x1xf32> -> vector<2x8x1xf32>
    %73 = vector.broadcast %72 : vector<2x8x1xf32> to vector<2x8x8xf32>
    %74 = arith.mulf %69, %73 : vector<2x8x8xf32>
    %75 = arith.truncf %74 : vector<2x8x8xf32> to vector<2x8x8xbf16>
    %cst_26 = arith.constant dense<0.000000e+00> : vector<2x8x4xf32>
    %76 = tpu.matmul %75, %63, %cst_26 {dimension_numbers = #tpu.dot_dimension_numbers<[2], [1], [1], [2], [0, 0, 0, 1, 1, 2], [0], [0]>} : vector<2x8x8xbf16>, vector<2x8x4xbf16>, vector<2x8x4xf32> -> vector<2x8x4xf32>
    %77 = vector.shape_cast %76 : vector<2x8x4xf32> to vector<16x4xf32>
    %78 = arith.truncf %77 : vector<16x4xf32> to vector<16x4xbf16>
    %c8 = arith.constant 8 : index
    %c0_27 = arith.constant 0 : index
    %79 = vector.load %arg5[%c8, %c0_27] : memref<32x32xbf16, #tpu.memory_space<vmem>>, vector<4x32xbf16>
    %cst_28 = arith.constant dense<0.000000e+00> : vector<16x32xf32>
    %80 = tpu.matmul %78, %79, %cst_28 {dimension_numbers = #tpu.dot_dimension_numbers<[1], [0], [0], [1], [0, 0, 1, 1], [], []>} : vector<16x4xbf16>, vector<4x32xbf16>, vector<16x32xf32> -> vector<16x32xf32>
    %81 = arith.addf %57, %80 : vector<16x32xf32>
    %82 = vector.extract_strided_slice %8 {offsets = [0, 12], sizes = [16, 4], strides = [1, 1]} : vector<16x32xbf16> to vector<16x4xbf16>
    %83 = vector.shape_cast %82 : vector<16x4xbf16> to vector<2x8x4xbf16>
    %84 = vector.extract_strided_slice %6 {offsets = [0, 12], sizes = [16, 4], strides = [1, 1]} : vector<16x32xbf16> to vector<16x4xbf16>
    %85 = vector.shape_cast %84 : vector<16x4xbf16> to vector<2x8x4xbf16>
    %86 = vector.extract_strided_slice %10 {offsets = [0, 12], sizes = [16, 4], strides = [1, 1]} : vector<16x32xbf16> to vector<16x4xbf16>
    %87 = vector.shape_cast %86 : vector<16x4xbf16> to vector<2x8x4xbf16>
    %cst_29 = arith.constant dense<0.000000e+00> : vector<2x8x8xf32>
    %88 = tpu.matmul %83, %85, %cst_29 {dimension_numbers = #tpu.dot_dimension_numbers<[2], [2], [1], [1], [0, 0, 0, 1, 1, 1], [0], [0]>} : vector<2x8x4xbf16>, vector<2x8x4xbf16>, vector<2x8x8xf32> -> vector<2x8x8xf32>
    %cst_30 = arith.constant dense<0xFF800000> : vector<2x8xf32>
    %89 = vector.multi_reduction <maximumf>, %88, %cst_30 [2] : vector<2x8x8xf32> to vector<2x8xf32>
    %90 = vector.shape_cast %89 : vector<2x8xf32> to vector<2x8x1xf32>
    %91 = vector.broadcast %90 : vector<2x8x1xf32> to vector<2x8x8xf32>
    %92 = arith.subf %88, %91 : vector<2x8x8xf32>
    %93 = math.exp %92 : vector<2x8x8xf32>
    %cst_31 = arith.constant dense<0.000000e+00> : vector<2x8xf32>
    %94 = vector.multi_reduction <add>, %93, %cst_31 [2] : vector<2x8x8xf32> to vector<2x8xf32>
    %95 = vector.shape_cast %94 : vector<2x8xf32> to vector<2x8x1xf32>
    %96 = tpu.reciprocal %95 {approx = true} : vector<2x8x1xf32> -> vector<2x8x1xf32>
    %97 = vector.broadcast %96 : vector<2x8x1xf32> to vector<2x8x8xf32>
    %98 = arith.mulf %93, %97 : vector<2x8x8xf32>
    %99 = arith.truncf %98 : vector<2x8x8xf32> to vector<2x8x8xbf16>
    %cst_32 = arith.constant dense<0.000000e+00> : vector<2x8x4xf32>
    %100 = tpu.matmul %99, %87, %cst_32 {dimension_numbers = #tpu.dot_dimension_numbers<[2], [1], [1], [2], [0, 0, 0, 1, 1, 2], [0], [0]>} : vector<2x8x8xbf16>, vector<2x8x4xbf16>, vector<2x8x4xf32> -> vector<2x8x4xf32>
    %101 = vector.shape_cast %100 : vector<2x8x4xf32> to vector<16x4xf32>
    %102 = arith.truncf %101 : vector<16x4xf32> to vector<16x4xbf16>
    %c12 = arith.constant 12 : index
    %c0_33 = arith.constant 0 : index
    %103 = vector.load %arg5[%c12, %c0_33] : memref<32x32xbf16, #tpu.memory_space<vmem>>, vector<4x32xbf16>
    %cst_34 = arith.constant dense<0.000000e+00> : vector<16x32xf32>
    %104 = tpu.matmul %102, %103, %cst_34 {dimension_numbers = #tpu.dot_dimension_numbers<[1], [0], [0], [1], [0, 0, 1, 1], [], []>} : vector<16x4xbf16>, vector<4x32xbf16>, vector<16x32xf32> -> vector<16x32xf32>
    %105 = arith.addf %81, %104 : vector<16x32xf32>
    %106 = vector.extract_strided_slice %8 {offsets = [0, 16], sizes = [16, 4], strides = [1, 1]} : vector<16x32xbf16> to vector<16x4xbf16>
    %107 = vector.shape_cast %106 : vector<16x4xbf16> to vector<2x8x4xbf16>
    %108 = vector.extract_strided_slice %6 {offsets = [0, 16], sizes = [16, 4], strides = [1, 1]} : vector<16x32xbf16> to vector<16x4xbf16>
    %109 = vector.shape_cast %108 : vector<16x4xbf16> to vector<2x8x4xbf16>
    %110 = vector.extract_strided_slice %10 {offsets = [0, 16], sizes = [16, 4], strides = [1, 1]} : vector<16x32xbf16> to vector<16x4xbf16>
    %111 = vector.shape_cast %110 : vector<16x4xbf16> to vector<2x8x4xbf16>
    %cst_35 = arith.constant dense<0.000000e+00> : vector<2x8x8xf32>
    %112 = tpu.matmul %107, %109, %cst_35 {dimension_numbers = #tpu.dot_dimension_numbers<[2], [2], [1], [1], [0, 0, 0, 1, 1, 1], [0], [0]>} : vector<2x8x4xbf16>, vector<2x8x4xbf16>, vector<2x8x8xf32> -> vector<2x8x8xf32>
    %cst_36 = arith.constant dense<0xFF800000> : vector<2x8xf32>
    %113 = vector.multi_reduction <maximumf>, %112, %cst_36 [2] : vector<2x8x8xf32> to vector<2x8xf32>
    %114 = vector.shape_cast %113 : vector<2x8xf32> to vector<2x8x1xf32>
    %115 = vector.broadcast %114 : vector<2x8x1xf32> to vector<2x8x8xf32>
    %116 = arith.subf %112, %115 : vector<2x8x8xf32>
    %117 = math.exp %116 : vector<2x8x8xf32>
    %cst_37 = arith.constant dense<0.000000e+00> : vector<2x8xf32>
    %118 = vector.multi_reduction <add>, %117, %cst_37 [2] : vector<2x8x8xf32> to vector<2x8xf32>
    %119 = vector.shape_cast %118 : vector<2x8xf32> to vector<2x8x1xf32>
    %120 = tpu.reciprocal %119 {approx = true} : vector<2x8x1xf32> -> vector<2x8x1xf32>
    %121 = vector.broadcast %120 : vector<2x8x1xf32> to vector<2x8x8xf32>
    %122 = arith.mulf %117, %121 : vector<2x8x8xf32>
    %123 = arith.truncf %122 : vector<2x8x8xf32> to vector<2x8x8xbf16>
    %cst_38 = arith.constant dense<0.000000e+00> : vector<2x8x4xf32>
    %124 = tpu.matmul %123, %111, %cst_38 {dimension_numbers = #tpu.dot_dimension_numbers<[2], [1], [1], [2], [0, 0, 0, 1, 1, 2], [0], [0]>} : vector<2x8x8xbf16>, vector<2x8x4xbf16>, vector<2x8x4xf32> -> vector<2x8x4xf32>
    %125 = vector.shape_cast %124 : vector<2x8x4xf32> to vector<16x4xf32>
    %126 = arith.truncf %125 : vector<16x4xf32> to vector<16x4xbf16>
    %c16 = arith.constant 16 : index
    %c0_39 = arith.constant 0 : index
    %127 = vector.load %arg5[%c16, %c0_39] : memref<32x32xbf16, #tpu.memory_space<vmem>>, vector<4x32xbf16>
    %cst_40 = arith.constant dense<0.000000e+00> : vector<16x32xf32>
    %128 = tpu.matmul %126, %127, %cst_40 {dimension_numbers = #tpu.dot_dimension_numbers<[1], [0], [0], [1], [0, 0, 1, 1], [], []>} : vector<16x4xbf16>, vector<4x32xbf16>, vector<16x32xf32> -> vector<16x32xf32>
    %129 = arith.addf %105, %128 : vector<16x32xf32>
    %130 = vector.extract_strided_slice %8 {offsets = [0, 20], sizes = [16, 4], strides = [1, 1]} : vector<16x32xbf16> to vector<16x4xbf16>
    %131 = vector.shape_cast %130 : vector<16x4xbf16> to vector<2x8x4xbf16>
    %132 = vector.extract_strided_slice %6 {offsets = [0, 20], sizes = [16, 4], strides = [1, 1]} : vector<16x32xbf16> to vector<16x4xbf16>
    %133 = vector.shape_cast %132 : vector<16x4xbf16> to vector<2x8x4xbf16>
    %134 = vector.extract_strided_slice %10 {offsets = [0, 20], sizes = [16, 4], strides = [1, 1]} : vector<16x32xbf16> to vector<16x4xbf16>
    %135 = vector.shape_cast %134 : vector<16x4xbf16> to vector<2x8x4xbf16>
    %cst_41 = arith.constant dense<0.000000e+00> : vector<2x8x8xf32>
    %136 = tpu.matmul %131, %133, %cst_41 {dimension_numbers = #tpu.dot_dimension_numbers<[2], [2], [1], [1], [0, 0, 0, 1, 1, 1], [0], [0]>} : vector<2x8x4xbf16>, vector<2x8x4xbf16>, vector<2x8x8xf32> -> vector<2x8x8xf32>
    %cst_42 = arith.constant dense<0xFF800000> : vector<2x8xf32>
    %137 = vector.multi_reduction <maximumf>, %136, %cst_42 [2] : vector<2x8x8xf32> to vector<2x8xf32>
    %138 = vector.shape_cast %137 : vector<2x8xf32> to vector<2x8x1xf32>
    %139 = vector.broadcast %138 : vector<2x8x1xf32> to vector<2x8x8xf32>
    %140 = arith.subf %136, %139 : vector<2x8x8xf32>
    %141 = math.exp %140 : vector<2x8x8xf32>
    %cst_43 = arith.constant dense<0.000000e+00> : vector<2x8xf32>
    %142 = vector.multi_reduction <add>, %141, %cst_43 [2] : vector<2x8x8xf32> to vector<2x8xf32>
    %143 = vector.shape_cast %142 : vector<2x8xf32> to vector<2x8x1xf32>
    %144 = tpu.reciprocal %143 {approx = true} : vector<2x8x1xf32> -> vector<2x8x1xf32>
    %145 = vector.broadcast %144 : vector<2x8x1xf32> to vector<2x8x8xf32>
    %146 = arith.mulf %141, %145 : vector<2x8x8xf32>
    %147 = arith.truncf %146 : vector<2x8x8xf32> to vector<2x8x8xbf16>
    %cst_44 = arith.constant dense<0.000000e+00> : vector<2x8x4xf32>
    %148 = tpu.matmul %147, %135, %cst_44 {dimension_numbers = #tpu.dot_dimension_numbers<[2], [1], [1], [2], [0, 0, 0, 1, 1, 2], [0], [0]>} : vector<2x8x8xbf16>, vector<2x8x4xbf16>, vector<2x8x4xf32> -> vector<2x8x4xf32>
    %149 = vector.shape_cast %148 : vector<2x8x4xf32> to vector<16x4xf32>
    %150 = arith.truncf %149 : vector<16x4xf32> to vector<16x4xbf16>
    %c20 = arith.constant 20 : index
    %c0_45 = arith.constant 0 : index
    %151 = vector.load %arg5[%c20, %c0_45] : memref<32x32xbf16, #tpu.memory_space<vmem>>, vector<4x32xbf16>
    %cst_46 = arith.constant dense<0.000000e+00> : vector<16x32xf32>
    %152 = tpu.matmul %150, %151, %cst_46 {dimension_numbers = #tpu.dot_dimension_numbers<[1], [0], [0], [1], [0, 0, 1, 1], [], []>} : vector<16x4xbf16>, vector<4x32xbf16>, vector<16x32xf32> -> vector<16x32xf32>
    %153 = arith.addf %129, %152 : vector<16x32xf32>
    %154 = vector.extract_strided_slice %8 {offsets = [0, 24], sizes = [16, 4], strides = [1, 1]} : vector<16x32xbf16> to vector<16x4xbf16>
    %155 = vector.shape_cast %154 : vector<16x4xbf16> to vector<2x8x4xbf16>
    %156 = vector.extract_strided_slice %6 {offsets = [0, 24], sizes = [16, 4], strides = [1, 1]} : vector<16x32xbf16> to vector<16x4xbf16>
    %157 = vector.shape_cast %156 : vector<16x4xbf16> to vector<2x8x4xbf16>
    %158 = vector.extract_strided_slice %10 {offsets = [0, 24], sizes = [16, 4], strides = [1, 1]} : vector<16x32xbf16> to vector<16x4xbf16>
    %159 = vector.shape_cast %158 : vector<16x4xbf16> to vector<2x8x4xbf16>
    %cst_47 = arith.constant dense<0.000000e+00> : vector<2x8x8xf32>
    %160 = tpu.matmul %155, %157, %cst_47 {dimension_numbers = #tpu.dot_dimension_numbers<[2], [2], [1], [1], [0, 0, 0, 1, 1, 1], [0], [0]>} : vector<2x8x4xbf16>, vector<2x8x4xbf16>, vector<2x8x8xf32> -> vector<2x8x8xf32>
    %cst_48 = arith.constant dense<0xFF800000> : vector<2x8xf32>
    %161 = vector.multi_reduction <maximumf>, %160, %cst_48 [2] : vector<2x8x8xf32> to vector<2x8xf32>
    %162 = vector.shape_cast %161 : vector<2x8xf32> to vector<2x8x1xf32>
    %163 = vector.broadcast %162 : vector<2x8x1xf32> to vector<2x8x8xf32>
    %164 = arith.subf %160, %163 : vector<2x8x8xf32>
    %165 = math.exp %164 : vector<2x8x8xf32>
    %cst_49 = arith.constant dense<0.000000e+00> : vector<2x8xf32>
    %166 = vector.multi_reduction <add>, %165, %cst_49 [2] : vector<2x8x8xf32> to vector<2x8xf32>
    %167 = vector.shape_cast %166 : vector<2x8xf32> to vector<2x8x1xf32>
    %168 = tpu.reciprocal %167 {approx = true} : vector<2x8x1xf32> -> vector<2x8x1xf32>
    %169 = vector.broadcast %168 : vector<2x8x1xf32> to vector<2x8x8xf32>
    %170 = arith.mulf %165, %169 : vector<2x8x8xf32>
    %171 = arith.truncf %170 : vector<2x8x8xf32> to vector<2x8x8xbf16>
    %cst_50 = arith.constant dense<0.000000e+00> : vector<2x8x4xf32>
    %172 = tpu.matmul %171, %159, %cst_50 {dimension_numbers = #tpu.dot_dimension_numbers<[2], [1], [1], [2], [0, 0, 0, 1, 1, 2], [0], [0]>} : vector<2x8x8xbf16>, vector<2x8x4xbf16>, vector<2x8x4xf32> -> vector<2x8x4xf32>
    %173 = vector.shape_cast %172 : vector<2x8x4xf32> to vector<16x4xf32>
    %174 = arith.truncf %173 : vector<16x4xf32> to vector<16x4xbf16>
    %c24 = arith.constant 24 : index
    %c0_51 = arith.constant 0 : index
    %175 = vector.load %arg5[%c24, %c0_51] : memref<32x32xbf16, #tpu.memory_space<vmem>>, vector<4x32xbf16>
    %cst_52 = arith.constant dense<0.000000e+00> : vector<16x32xf32>
    %176 = tpu.matmul %174, %175, %cst_52 {dimension_numbers = #tpu.dot_dimension_numbers<[1], [0], [0], [1], [0, 0, 1, 1], [], []>} : vector<16x4xbf16>, vector<4x32xbf16>, vector<16x32xf32> -> vector<16x32xf32>
    %177 = arith.addf %153, %176 : vector<16x32xf32>
    %178 = vector.extract_strided_slice %8 {offsets = [0, 28], sizes = [16, 4], strides = [1, 1]} : vector<16x32xbf16> to vector<16x4xbf16>
    %179 = vector.shape_cast %178 : vector<16x4xbf16> to vector<2x8x4xbf16>
    %180 = vector.extract_strided_slice %6 {offsets = [0, 28], sizes = [16, 4], strides = [1, 1]} : vector<16x32xbf16> to vector<16x4xbf16>
    %181 = vector.shape_cast %180 : vector<16x4xbf16> to vector<2x8x4xbf16>
    %182 = vector.extract_strided_slice %10 {offsets = [0, 28], sizes = [16, 4], strides = [1, 1]} : vector<16x32xbf16> to vector<16x4xbf16>
    %183 = vector.shape_cast %182 : vector<16x4xbf16> to vector<2x8x4xbf16>
    %cst_53 = arith.constant dense<0.000000e+00> : vector<2x8x8xf32>
    %184 = tpu.matmul %179, %181, %cst_53 {dimension_numbers = #tpu.dot_dimension_numbers<[2], [2], [1], [1], [0, 0, 0, 1, 1, 1], [0], [0]>} : vector<2x8x4xbf16>, vector<2x8x4xbf16>, vector<2x8x8xf32> -> vector<2x8x8xf32>
    %cst_54 = arith.constant dense<0xFF800000> : vector<2x8xf32>
    %185 = vector.multi_reduction <maximumf>, %184, %cst_54 [2] : vector<2x8x8xf32> to vector<2x8xf32>
    %186 = vector.shape_cast %185 : vector<2x8xf32> to vector<2x8x1xf32>
    %187 = vector.broadcast %186 : vector<2x8x1xf32> to vector<2x8x8xf32>
    %188 = arith.subf %184, %187 : vector<2x8x8xf32>
    %189 = math.exp %188 : vector<2x8x8xf32>
    %cst_55 = arith.constant dense<0.000000e+00> : vector<2x8xf32>
    %190 = vector.multi_reduction <add>, %189, %cst_55 [2] : vector<2x8x8xf32> to vector<2x8xf32>
    %191 = vector.shape_cast %190 : vector<2x8xf32> to vector<2x8x1xf32>
    %192 = tpu.reciprocal %191 {approx = true} : vector<2x8x1xf32> -> vector<2x8x1xf32>
    %193 = vector.broadcast %192 : vector<2x8x1xf32> to vector<2x8x8xf32>
    %194 = arith.mulf %189, %193 : vector<2x8x8xf32>
    %195 = arith.truncf %194 : vector<2x8x8xf32> to vector<2x8x8xbf16>
    %cst_56 = arith.constant dense<0.000000e+00> : vector<2x8x4xf32>
    %196 = tpu.matmul %195, %183, %cst_56 {dimension_numbers = #tpu.dot_dimension_numbers<[2], [1], [1], [2], [0, 0, 0, 1, 1, 2], [0], [0]>} : vector<2x8x8xbf16>, vector<2x8x4xbf16>, vector<2x8x4xf32> -> vector<2x8x4xf32>
    %197 = vector.shape_cast %196 : vector<2x8x4xf32> to vector<16x4xf32>
    %198 = arith.truncf %197 : vector<16x4xf32> to vector<16x4xbf16>
    %c28 = arith.constant 28 : index
    %c0_57 = arith.constant 0 : index
    %199 = vector.load %arg5[%c28, %c0_57] : memref<32x32xbf16, #tpu.memory_space<vmem>>, vector<4x32xbf16>
    %cst_58 = arith.constant dense<0.000000e+00> : vector<16x32xf32>
    %200 = tpu.matmul %198, %199, %cst_58 {dimension_numbers = #tpu.dot_dimension_numbers<[1], [0], [0], [1], [0, 0, 1, 1], [], []>} : vector<16x4xbf16>, vector<4x32xbf16>, vector<16x32xf32> -> vector<16x32xf32>
    %201 = arith.addf %177, %200 : vector<16x32xf32>
    %c0_59 = arith.constant 0 : index
    %c0_60 = arith.constant 0 : index
    %202 = vector.load %arg6[%c0_59, %c0_60] : memref<1x32xf32, #tpu.memory_space<vmem>>, vector<1x32xf32>
    %203 = vector.broadcast %202 : vector<1x32xf32> to vector<16x32xf32>
    %204 = arith.addf %201, %203 : vector<16x32xf32>
    %205 = vector.shape_cast %204 : vector<16x32xf32> to vector<2x8x32xf32>
    %c0_61 = arith.constant 0 : index
    %c0_62 = arith.constant 0 : index
    %c0_63 = arith.constant 0 : index
    %206 = vector.load %arg7[%c0_61, %c0_62, %c0_63] : memref<2x8x32xf32, #tpu.memory_space<vmem>>, vector<2x8x32xf32>
    tpu.vector_store %arg7[%c0_61, %c0_62, %c0_63], %205 {strides = array<i32>} : memref<2x8x32xf32, #tpu.memory_space<vmem>>, vector<2x8x32xf32>,
    return
  }
  func.func @transform_0(%arg0: i32) -> (i32, i32, i32) {
    %c0_i32 = arith.constant 0 : i32
    %c0_i32_0 = arith.constant 0 : i32
    %c0_i32_1 = arith.constant 0 : i32
    return %arg0, %c0_i32, %c0_i32_0 : i32, i32, i32
  }
  func.func @transform_1(%arg0: i32) -> (i32, i32) {
    %c0_i32 = arith.constant 0 : i32
    %c0_i32_0 = arith.constant 0 : i32
    %c0_i32_1 = arith.constant 0 : i32
    return %c0_i32, %c0_i32_0 : i32, i32
  }
  func.func @transform_2(%arg0: i32) -> (i32, i32) {
    %c0_i32 = arith.constant 0 : i32
    %c0_i32_0 = arith.constant 0 : i32
    %c0_i32_1 = arith.constant 0 : i32
    return %c0_i32, %c0_i32_0 : i32, i32
  }
  func.func @transform_3(%arg0: i32) -> (i32, i32) {
    %c0_i32 = arith.constant 0 : i32
    %c0_i32_0 = arith.constant 0 : i32
    %c0_i32_1 = arith.constant 0 : i32
    return %c0_i32, %c0_i32_0 : i32, i32
  }
  func.func @transform_4(%arg0: i32) -> (i32, i32) {
    %c0_i32 = arith.constant 0 : i32
    %c0_i32_0 = arith.constant 0 : i32
    %c0_i32_1 = arith.constant 0 : i32
    return %c0_i32, %c0_i32_0 : i32, i32
  }
  func.func @transform_5(%arg0: i32) -> (i32, i32) {
    %c0_i32 = arith.constant 0 : i32
    %c0_i32_0 = arith.constant 0 : i32
    %c0_i32_1 = arith.constant 0 : i32
    return %c0_i32, %c0_i32_0 : i32, i32
  }
  func.func @transform_6(%arg0: i32) -> (i32, i32, i32) {
    %c0_i32 = arith.constant 0 : i32
    %c0_i32_0 = arith.constant 0 : i32
    %c0_i32_1 = arith.constant 0 : i32
    return %arg0, %c0_i32, %c0_i32_0 : i32, i32, i32
  }
}

</mosaic_0001>

<bundles_post_ra>
// kernel: tpu_custom_call.1
= control target key start
LH: loop header
LB: loop body
LE: loop exit
PB: predicated region body
PF: predicated region fallthrough
CT: control target
= control target key end

     0   :  { %11 = vsyncpa [#allocation3], 0  ;;  %s3623_s0 = inlined_call_operand.hbm [shape: bf16[2,8,32], index: 0, kind: input, shape index: {}]   ;;  %s3624_s1 = inlined_call_operand.hbm [shape: bf16[32,32], index: 1, kind: input, shape index: {}]   ;;  %s3625_s2 = inlined_call_operand.hbm [shape: bf16[32,32], index: 2, kind: input, shape index: {}]   ;;  %s3626_s3 = inlined_call_operand.hbm [shape: bf16[32,32], index: 3, kind: input, shape index: {}]   ;;  %s3627_s4 = inlined_call_operand.hbm [shape: bf16[32,32], index: 4, kind: input, shape index: {}]   ;;  %s3628_s5 = inlined_call_operand.vmem [shape: f32[1,32], index: 5, kind: input, shape index: {}]   ;;  %s3629_s6 = inlined_call_operand.hbm [shape: f32[2,8,32], index: 6, kind: output, shape index: {}]  }
   0x1   :  { %12 = vsyncpa [#allocation6], 0 }
   0x2   :  { %13 = vsyncpa [#allocation9], 0 }
   0x3   :  { %14 = vsyncpa [#allocation4], 0  ;;  %s3137_s21 = smov [#allocation5]   ;;  %s3138_s23 = smov [#allocation8]  }
   0x4   :  { %s32_s22 = sshll.u32 %s3137_s21, 4  ;;  %s56_s24 = sshll.u32 %s3138_s23, 4  ;;  %s33_s22 = int_to_ptr.vmem [resolvable:$true] %s32_s22  ;;  %s57_s24 = int_to_ptr.vmem [resolvable:$true] %s56_s24 }
   0x5   :  { %s3017_s25 = scalar_lea.vmem %s33_s22, 256  ;;  %p3022_p1 = scmp.lt.s32.totalorder %s33_s22, %s33_s22 }
   0x6   :  { %p3018_p0 = scmp.ne.s32.totalorder %s33_s22, %s3017_s25  ;;  %p3023_p2 = scmp.lt.s32.totalorder %s3017_s25, %s3017_s25 }
   0x8   :  { %p3024_p3 = por %p3023_p2, %p3022_p1 }
   0xa   :  { %p3025_p4 = pnand %p3024_p3, %p3018_p0 }
   0xc   :  { %3028 = shalt.err (!%p3025_p4)
}
   0xd   :  { %s3139_s26 = smov 64   ;;  %s3140_s27 = smov 4  }
   0xe   :  { %38 = dma.hbm_to_vmem [thread:$0]  %s3624_s1, 256, %s33_s22, [#allocation6], %s3139_s26, %s3139_s26, %s3140_s27  }
   0xf   :  { %s3037_s30 = scalar_lea.vmem %s57_s24, 256  ;;  %p3042_p6 = scmp.lt.s32.totalorder %s57_s24, %s57_s24 }
  0x10   :  { %p3038_p5 = scmp.ne.s32.totalorder %s57_s24, %s3037_s30  ;;  %p3043_p7 = scmp.lt.s32.totalorder %s3037_s30, %s3037_s30 }
  0x12   :  { %p3044_p8 = por %p3043_p7, %p3042_p6 }
  0x14   :  { %p3045_p9 = pnand %p3044_p8, %p3038_p5 }
  0x16   :  { %3048 = shalt.err (!%p3045_p9)
}
  0x17   :  { %62 = dma.hbm_to_vmem [thread:$0]  %s3626_s3, 256, %s57_s24, [#allocation9], %s3139_s26, %s3139_s26, %s3140_s27  }
  0x18   :  { %s3141_s9 = smov [#allocation2]   ;;  %s3142_s11 = smov [#allocation7]  }
  0x19   :  { %s20_s10 = sshll.u32 %s3141_s9, 4  ;;  %s44_s12 = sshll.u32 %s3142_s11, 4  ;;  %s21_s10 = int_to_ptr.vmem [resolvable:$true] %s20_s10  ;;  %s45_s12 = int_to_ptr.vmem [resolvable:$true] %s44_s12 }
  0x1a   :  { %s3057_s1 = scalar_lea.vmem %s21_s10, 128  ;;  %p3062_p11 = scmp.lt.s32.totalorder %s21_s10, %s21_s10 }
  0x1b   :  { %p3058_p10 = scmp.ne.s32.totalorder %s21_s10, %s3057_s1  ;;  %p3063_p12 = scmp.lt.s32.totalorder %s3057_s1, %s3057_s1 }
  0x1d   :  { %p3064_p13 = por %p3063_p12, %p3062_p11 }
  0x1f   :  { %p3065_p0 = pnand %p3064_p13, %p3058_p10 }
  0x21   :  { %3068 = shalt.err (!%p3065_p0)
}
  0x22   :  { %26 = dma.hbm_to_vmem [thread:$0]  %s3623_s0, 128, %s21_s10, [#allocation3], %s3139_s26, %s3139_s26, %s3140_s27  }
  0x23   :  { %s3077_s3 = scalar_lea.vmem %s45_s12, 256  ;;  %p3082_p2 = scmp.lt.s32.totalorder %s45_s12, %s45_s12 }
  0x24   :  { %p3078_p1 = scmp.ne.s32.totalorder %s45_s12, %s3077_s3  ;;  %p3083_p3 = scmp.lt.s32.totalorder %s3077_s3, %s3077_s3 }
  0x26   :  { %p3084_p4 = por %p3083_p3, %p3082_p2 }
  0x28   :  { %p3085_p5 = pnand %p3084_p4, %p3078_p1 }
  0x2a   :  { %3088 = shalt.err (!%p3085_p5)
}
  0x2b   :  { %50 = dma.hbm_to_vmem [thread:$0]  %s3625_s2, 256, %s45_s12, [#allocation6], %s3139_s26, %s3139_s26, %s3140_s27  }
  0x2c   :  { %s3143_s17 = smov [#allocation10]  }
  0x2d   :  { %s68_s18 = sshll.u32 %s3143_s17, 4  ;;  %s69_s18 = int_to_ptr.vmem [resolvable:$true] %s68_s18 }
  0x2e   :  { %s3097_s19 = scalar_lea.vmem %s69_s18, 256  ;;  %p3102_p7 = scmp.lt.s32.totalorder %s69_s18, %s69_s18 }
  0x2f   :  { %p3098_p6 = scmp.ne.s32.totalorder %s69_s18, %s3097_s19  ;;  %p3103_p8 = scmp.lt.s32.totalorder %s3097_s19, %s3097_s19 }
  0x31   :  { %p3104_p9 = por %p3103_p8, %p3102_p7 }
  0x33   :  { %p3105_p10 = pnand %p3104_p9, %p3098_p6 }
  0x35   :  { %3108 = shalt.err (!%p3105_p10)
}
  0x36   :  { %74 = dma.hbm_to_vmem [thread:$0]  %s3627_s4, 256, %s69_s18, [#allocation9], %s3139_s26, %s3139_s26, %s3140_s27  }
  0x37   :  { %3129 = dma.done.wait [#allocation3], 128  }
  0x38   :  { %3130 = vsyncadd [#allocation3], 4294967168 }
  0x39   :  { %3131 = dma.done.wait [#allocation6], 512  }
  0x3a   :  { %3132 = vsyncadd [#allocation6], 4294966784 }
  0x3b   :  { %3133 = dma.done.wait [#allocation9], 512  }
  0x3c   :  { %3134 = vsyncadd [#allocation9], 4294966784  ;;  %v3144_v0 = vmov 0.0   ;;  %vm3145_vm0 = vmmov 0   ;;  %v2934_v1 = vld [vmem:[#allocation5 + $0x8] sm:$0xff]   ;;  %v2935_v2 = vld [vmem:[#allocation7 + $0x8] sm:$0xff]  }
  0x3d   :  { %2651 = vmatprep.subr.bf16.mxu0 %v3144_v0  ;;  %2659 = vmatprep.subr.bf16.mxu1 %v3144_v0  ;;  %v2936_v3 = vld [vmem:[#allocation5] sm:$0xff]   ;;  %v2938_v4 = vld [vmem:[#allocation7] sm:$0xff]   ;;  %v2937_v5 = vld [vmem:[#allocation2] sm:$0xff]   ;;  %vm124_vm1 = vcmask 261120   ;;  %vm293_vm2 = vcmask 31744   ;;  %s3146_s2 = smov 124  }
  0x3e   :  { %2655 = vmatprep.mubr.msk.bf16.mxu0 %vm3145_vm0, %v3144_v0  ;;  %2663 = vmatprep.mubr.msk.bf16.mxu1 %vm3145_vm0, %v3144_v0  ;;  %v2939_v6 = vld [vmem:[#allocation8 + $0x8] sm:$0xff]   ;;  %v2940_v7 = vld [vmem:[#allocation8] sm:$0xff]   ;;  %vm414_vm3 = vcmask 1043456   ;;  %vm386_vm4 = vcmask 64512   ;;  %s3147_s4 = smov 120   ;;  %vm735_vm5 = vcmask 1041408  }
  0x3f   :  { %2652 = vmatpush3.bf16.msra.mxu0 %v2934_v1  ;;  %2660 = vmatpush3.bf16.msra.mxu1 %v2935_v2  ;;  %s3148_s21 = smov 116   ;;  %s3149_s22 = smov 112  }
  0x40   :  { %2653 = vmatprep.subr.bf16.mxu0 %v3144_v0  ;;  %2661 = vmatprep.subr.bf16.mxu1 %v3144_v0  ;;  %s3150_s23 = smov 108   ;;  %s3151_s24 = smov 104  }
  0x41   :  { %s3152_s25 = smov 100   ;;  %s3153_s28 = smov [#allocation11]  }
  0x42   :  { %s2481_s29 = sshll.u32 %s3153_s28, 4  ;;  %s2482_s29 = int_to_ptr.vmem [resolvable:$true] %s2481_s29 }
  0x43   :  { %2654 = vmatpush3.bf16.msra.mxu0 %v2936_v3  ;;  %2662 = vmatpush3.bf16.msra.mxu1 %v2938_v4  ;;  %s3109_s30 = scalar_lea.vmem %s2482_s29, 256  ;;  %p3114_p12 = scmp.lt.s32.totalorder %s2482_s29, %s2482_s29 }
  0x44   :  { %2667 = vmatprep.subr.bf16.mxu0 %v3144_v0  ;;  %2675 = vmatprep.subr.bf16.mxu1 %v3144_v0  ;;  %p3110_p11 = scmp.ne.s32.totalorder %s2482_s29, %s3109_s30  ;;  %p3115_p13 = scmp.lt.s32.totalorder %s3109_s30, %s3109_s30 }
  0x46   :  { %2656 = vmatmul.mubr.msk.bf16.vlgmr.msra.gmra.mxu0 %vm124_vm1, %v2937_v5  ;;  %2664 = vmatmul.mubr.msk.bf16.vlgmr.msra.gmra.mxu1 %vm124_vm1, %v2937_v5  ;;  %p3116_p0 = por %p3115_p13, %p3114_p12 }
  0x47   :  { %2668 = vmatpush3.bf16.msra.mxu0 %v2939_v6  ;;  %2671 = vmatprep.mubr.msk.bf16.mxu0 %vm3145_vm0, %v3144_v0 }
  0x48   :  { %2669 = vmatprep.subr.bf16.mxu0 %v3144_v0  ;;  %2677 = vmatprep.mubr.msk.bf16.mxu1 %vm3145_vm0, %v3144_v0  ;;  %p3117_p1 = pnand %p3116_p0, %p3110_p11 }
  0x4b   :  { %2670 = vmatpush3.bf16.msra.mxu0 %v2940_v7 }
  0x4c   :  { %2681 = vmatprep.subr.bf16.mxu0 %v3144_v0 }
  0x4e   :  { %2672 = vmatmul.mubr.msk.bf16.vlgmr.msra.gmra.mxu0 %vm124_vm1, %v2937_v5 }
  0x4f   :  { %2683 = vmatprep.mubr.msk.bf16.mxu0 %vm3145_vm0, %v3144_v0 }
 0x106   :  { %v162_v8 = vpop.f32.mrf.mxu0  ;;  %v216_v10 = vpop.f32.mrf.mxu1 }
 0x107   :  { %v3242_v9 = vpack.c.bf16 %v162_v8, %v162_v8  ;;  %v3249_v18 = vpack.c.bf16 %v216_v10, %v216_v10 }
 0x108   :  { %v2657_v11 = vpop.f32.mrf.mxu0  ;;  %v2665_v13 = vpop.f32.mrf.mxu1 }
 0x109   :  { %v298_v12 = vsel %vm293_vm2, %v3242_v9, 0 }
 0x10a   :  { %v165_v14 = vpop.f32.mrf.mxu0  ;;  %2676 = vmatpush3.bf16.xpose.msra.mxu1 %v298_v12  ;;  %v219_v16 = vpop.f32.mrf.mxu1 }
 0x10b   :  { %v3246_v15 = vpack.c.bf16 %v165_v14, %v165_v14  ;;  %2687 = vmatprep.subr.bf16.mxu1 %v3144_v0  ;;  %v3260_v24 = vpack.c.bf16 %v219_v16, %v219_v16 }
 0x10c   :  { %v2658_v17 = vpop.f32.mrf.mxu0  ;;  %v2666_v20 = vpop.f32.mrf.mxu1 }
 0x10d   :  { %558 = vrot.lane.b32.xlu1 %v3246_v15, %s3146_s2  ;;  %v344_v19 = vsel %vm293_vm2, %v3246_v15, 0 }
 0x10e   :  { %2682 = vmatpush3.bf16.xpose.msra.mxu0 %v344_v19  ;;  %v270_v21 = vpop.f32.mrf.mxu0 }
 0x10f   :  { %2693 = vmatprep.subr.bf16.mxu0 %v3144_v0  ;;  %v3266_v26 = vpack.c.bf16 %v270_v21, %v270_v21 }
 0x110   :  { %v2673_v22 = vpop.f32.mrf.mxu0 }
 0x111   :  { %2678 = vmatmul.mubr.msk.bf16.vlgmr.msra.gmra.mxu1 %vm293_vm2, %v3249_v18  ;;  %v416_v28 = vsel %vm414_vm3, %v3266_v26, 0 }
 0x112   :  { %v273_v23 = vpop.f32.mrf.mxu0  ;;  %2689 = vmatprep.mubr.msk.bf16.mxu1 %vm3145_vm0, %v3144_v0  ;;  %2688 = vmatpush3.bf16.msra.mxu1 %v416_v28 }
 0x113   :  { %v3268_v27 = vpack.c.bf16 %v273_v23, %v273_v23  ;;  %2699 = vmatprep.subr.bf16.mxu1 %v3144_v0 }
 0x114   :  { %v2674_v25 = vpop.f32.mrf.mxu0 }
 0x115   :  { %2684 = vmatmul.mubr.msk.bf16.vlgmr.msra.gmra.mxu0 %vm293_vm2, %v3260_v24  ;;  %v462_v29 = vsel %vm414_vm3, %v3268_v27, 0 }
 0x116   :  { %2695 = vmatprep.mubr.msk.bf16.mxu0 %vm3145_vm0, %v3144_v0  ;;  %2694 = vmatpush3.bf16.msra.mxu0 %v462_v29 }
 0x117   :  { %2705 = vmatprep.subr.bf16.mxu0 %v3144_v0 }
 0x17f   :  { %v559_v50 = vpop.permute.xlu1 %558 }
 0x180   :  { %v564_v61 = vsel %vm293_vm2, %v559_v50, 0 }
 0x1d1   :  { %v334_v30 = vpop.f32.mrf.mxu1 }
 0x1d2   :  { %v387_v31 = vsel %vm386_vm4, %v334_v30, -inf }
 0x1d3   :  { %388 = vmax.xlane.f32.xlu0 %v387_v31  ;;  %v2679_v32 = vpop.f32.mrf.mxu1 }
 0x1d5   :  { %v337_v33 = vpop.f32.mrf.mxu1  ;;  %v380_v34 = vpop.f32.mrf.mxu0 }
 0x1d6   :  { %v390_v35 = vsel %vm386_vm4, %v380_v34, -inf }
 0x1d7   :  { %v2680_v36 = vpop.f32.mrf.mxu1  ;;  %391 = vmax.xlane.f32.xlu0 %v390_v35  ;;  %v2685_v37 = vpop.f32.mrf.mxu0 }
 0x1d9   :  { %v383_v38 = vpop.f32.mrf.mxu0 }
 0x1db   :  { %v2686_v39 = vpop.f32.mrf.mxu0 }
 0x1ed   :  { %508 = vrot.lane.b32.xlu0 %v3242_v9, %s3146_s2 }
 0x25c   :  { %v389_v40 = vpop.xlane.xlu0 %388 }
 0x25d   :  { %v393_v41 = vsub.f32 %v334_v30, %v389_v40 }
 0x25f   :  { %v395_v42 = vmul.f32 1.442695, %v393_v41 }
 0x260   :  { %v392_v43 = vpop.xlane.xlu0 %391 }
 0x261   :  { %2945 = vpow2.f32 %v395_v42  ;;  %v394_v44 = vsub.f32 %v380_v34, %v392_v43 }
 0x263   :  { %v397_v45 = vmul.f32 1.442695, %v394_v44 }
 0x264   :  { %v509_v55 = vpop.permute.xlu0 %508 }
 0x265   :  { %2947 = vpow2.f32 %v397_v45  ;;  %v514_v58 = vsel %vm293_vm2, %v509_v55, 0 }
 0x26e   :  { %v2946_v46 = vpop.eup %2945 }
 0x26f   :  { %v399_v47 = vsel %vm386_vm4, %v2946_v46, 0.0 }
 0x270   :  { %400 = vadd.xlane.f32.xlu1 %v399_v47 }
 0x272   :  { %v2948_v48 = vpop.eup %2947 }
 0x273   :  { %v402_v49 = vsel %vm386_vm4, %v2948_v48, 0.0 }
 0x274   :  { %403 = vadd.xlane.f32.xlu1 %v402_v49 }
 0x285   :  { %506 = vrot.lane.b32.xlu1 %v3249_v18, %s3146_s2 }
 0x289   :  { %556 = vrot.lane.b32.xlu1 %v3260_v24, %s3146_s2 }
 0x2f9   :  { %v401_v51 = vpop.xlane.xlu1 %400 }
 0x2fa   :  { %2949 = vrcp.f32 %v401_v51 }
 0x2fd   :  { %v404_v52 = vpop.xlane.xlu1 %403 }
 0x2fe   :  { %2951 = vrcp.f32 %v404_v52 }
 0x301   :  { %v507_v62 = vpop.permute.xlu1 %506 }
 0x305   :  { %v557_v63 = vpop.permute.xlu1 %556 }
 0x307   :  { %v2950_v53 = vpop.eup %2949 }
 0x308   :  { %v407_v54 = vmul.f32 %v2950_v53, %v2946_v46  ;;  %v505_v46 = vld [vmem:[#allocation10] sm:$0x3] }
 0x309   :  { %v784_v49 = vsel %vm735_vm5, %v505_v46, 0 }
 0x30a   :  { %v409_v56 = vpack.c.bf16 %v407_v54, %v407_v54  ;;  %v2941_v54 = vld [vmem:[#allocation10] ss:$0 sps:$4 sm:$0xcc]  }
 0x30b   :  { %v2952_v57 = vpop.eup %2951  ;;  %v731_v55 = vrot.slane %v2941_v54, 2 }
 0x30c   :  { %2690 = vmatmul.mubr.msk.bf16.vlgmr.msra.gmra.mxu1 %vm386_vm4, %v409_v56  ;;  %v408_v59 = vmul.f32 %v2952_v57, %v2948_v48 }
 0x30d   :  { %2700 = vmatpush3.bf16.xpose.msra.mxu1 %v514_v58  ;;  %2701 = vmatprep.mubr.msk.bf16.mxu1 %vm3145_vm0, %v3144_v0  ;;  %v737_v56 = vsel %vm735_vm5, %v731_v55, 0 }
 0x30e   :  { %v410_v60 = vpack.c.bf16 %v408_v59, %v408_v59  ;;  %2711 = vmatprep.subr.bf16.mxu1 %v3144_v0 }
 0x310   :  { %2696 = vmatmul.mubr.msk.bf16.vlgmr.msra.gmra.mxu0 %vm386_vm4, %v410_v60 }
 0x311   :  { %2706 = vmatpush3.bf16.xpose.msra.mxu0 %v564_v61  ;;  %2707 = vmatprep.mubr.msk.bf16.mxu0 %vm3145_vm0, %v3144_v0 }
 0x312   :  { %2717 = vmatprep.subr.bf16.mxu0 %v3144_v0 }
 0x314   :  { %2702 = vmatmul.mubr.msk.bf16.vlgmr.msra.gmra.mxu1 %vm293_vm2, %v507_v62 }
 0x315   :  { %2713 = vmatprep.mubr.msk.bf16.mxu1 %vm3145_vm0, %v3144_v0 }
 0x318   :  { %2708 = vmatmul.mubr.msk.bf16.vlgmr.msra.gmra.mxu0 %vm293_vm2, %v557_v63 }
 0x319   :  { %2719 = vmatprep.mubr.msk.bf16.mxu0 %vm3145_vm0, %v3144_v0 }
 0x3cc   :  { %v3302_v1 = vpop.f32.mrf.mxu1 }
 0x3ce   :  { %v2691_v2 = vpop.f32.mrf.mxu1 }
 0x3d0   :  { %v455_v3 = vpop.f32.mrf.mxu1  ;;  %v3304_v4 = vpop.f32.mrf.mxu0 }
 0x3d1   :  { %v504_v5 = vpack.c.bf16 %v3304_v4, %v3302_v1 }
 0x3d2   :  { %v2692_v6 = vpop.f32.mrf.mxu1  ;;  %v2697_v7 = vpop.f32.mrf.mxu0 }
 0x3d4   :  { %v501_v8 = vpop.f32.mrf.mxu0  ;;  %v550_v10 = vpop.f32.mrf.mxu1 }
 0x3d5   :  { %v606_v11 = vsel %vm386_vm4, %v550_v10, -inf }
 0x3d6   :  { %607 = vmax.xlane.f32.xlu0 %v606_v11  ;;  %v2698_v12 = vpop.f32.mrf.mxu0  ;;  %v2703_v13 = vpop.f32.mrf.mxu1 }
 0x3d8   :  { %v553_v14 = vpop.f32.mrf.mxu1  ;;  %v600_v16 = vpop.f32.mrf.mxu0 }
 0x3d9   :  { %v609_v17 = vsel %vm386_vm4, %v600_v16, -inf }
 0x3da   :  { %v2704_v19 = vpop.f32.mrf.mxu1  ;;  %610 = vmax.xlane.f32.xlu1 %v609_v17  ;;  %v2709_v20 = vpop.f32.mrf.mxu0 }
 0x3dc   :  { %v603_v21 = vpop.f32.mrf.mxu0 }
 0x3de   :  { %v2710_v22 = vpop.f32.mrf.mxu0 }
 0x3eb   :  { %678 = vrot.lane.b32.xlu1 %v3268_v27, %s3146_s2 }
 0x3ef   :  { %829 = vrot.lane.b32.xlu1 %v3242_v9, %s3147_s4 }
 0x3f3   :  { %879 = vrot.lane.b32.xlu1 %v3246_v15, %s3147_s4 }
 0x3f7   :  { %877 = vrot.lane.b32.xlu1 %v3260_v24, %s3147_s4 }
 0x45f   :  { %v608_v23 = vpop.xlane.xlu0 %607 }
 0x460   :  { %v612_v25 = vsub.f32 %v550_v10, %v608_v23 }
 0x462   :  { %v614_v28 = vmul.f32 1.442695, %v612_v25 }
 0x463   :  { %v611_v29 = vpop.xlane.xlu1 %610 }
 0x464   :  { %2953 = vpow2.f32 %v614_v28  ;;  %v613_v30 = vsub.f32 %v600_v16, %v611_v29 }
 0x466   :  { %v616_v31 = vmul.f32 1.442695, %v613_v30 }
 0x467   :  { %v679_v32 = vpop.permute.xlu1 %678 }
 0x468   :  { %2955 = vpow2.f32 %v616_v31  ;;  %v684_v33 = vsel %vm414_vm3, %v679_v32, 0 }
 0x469   :  { %2718 = vmatpush3.bf16.msra.mxu0 %v684_v33 }
 0x46a   :  { %2729 = vmatprep.subr.bf16.mxu0 %v3144_v0 }
 0x46b   :  { %v830_v50 = vpop.permute.xlu1 %829 }
 0x46c   :  { %v835_v1 = vsel %vm293_vm2, %v830_v50, 0 }
 0x46f   :  { %v880_v51 = vpop.permute.xlu1 %879 }
 0x470   :  { %v885_v52 = vsel %vm293_vm2, %v880_v51, 0 }
 0x471   :  { %v2954_v34 = vpop.eup %2953 }
 0x472   :  { %v618_v35 = vsel %vm386_vm4, %v2954_v34, 0.0 }
 0x473   :  { %619 = vadd.xlane.f32.xlu0 %v618_v35  ;;  %v878_v53 = vpop.permute.xlu1 %877 }
 0x475   :  { %v2956_v36 = vpop.eup %2955 }
 0x476   :  { %v621_v37 = vsel %vm386_vm4, %v2956_v36, 0.0 }
 0x477   :  { %622 = vadd.xlane.f32.xlu0 %v621_v37 }
 0x48d   :  { %630 = vrot.lane.b32.xlu0 %v3266_v26, %s3146_s2 }
 0x491   :  { %827 = vrot.lane.b32.xlu0 %v3249_v18, %s3147_s4 }
 0x4fc   :  { %v620_v38 = vpop.xlane.xlu0 %619 }
 0x4fd   :  { %2957 = vrcp.f32 %v620_v38 }
 0x500   :  { %v623_v39 = vpop.xlane.xlu0 %622 }
 0x501   :  { %2959 = vrcp.f32 %v623_v39 }
 0x504   :  { %v631_v40 = vpop.permute.xlu0 %630 }
 0x505   :  { %v636_v41 = vsel %vm414_vm3, %v631_v40, 0 }
 0x506   :  { %2712 = vmatpush3.bf16.msra.mxu1 %v636_v41 }
 0x507   :  { %2723 = vmatprep.subr.bf16.mxu1 %v3144_v0 }
 0x50a   :  { %v2958_v42 = vpop.eup %2957 }
 0x50b   :  { %v626_v43 = vmul.f32 %v2958_v42, %v2954_v34 }
 0x50d   :  { %v628_v44 = vpack.c.bf16 %v626_v43, %v626_v43 }
 0x50e   :  { %v2960_v45 = vpop.eup %2959 }
 0x50f   :  { %2714 = vmatmul.mubr.msk.bf16.vlgmr.msra.gmra.mxu1 %vm386_vm4, %v628_v44  ;;  %v627_v47 = vmul.f32 %v2960_v45, %v2956_v36 }
 0x510   :  { %2725 = vmatprep.mubr.msk.bf16.mxu1 %vm3145_vm0, %v3144_v0  ;;  %2724 = vmatpush3.bf16.msra.mxu1 %v737_v56 }
 0x511   :  { %v629_v48 = vpack.c.bf16 %v627_v47, %v627_v47  ;;  %2735 = vmatprep.subr.bf16.mxu1 %v3144_v0 }
 0x513   :  { %2720 = vmatmul.mubr.msk.bf16.vlgmr.msra.gmra.mxu0 %vm386_vm4, %v629_v48 }
 0x514   :  { %2730 = vmatpush3.bf16.msra.mxu0 %v784_v49  ;;  %2731 = vmatprep.mubr.msk.bf16.mxu0 %vm3145_vm0, %v3144_v0 }
 0x515   :  { %2741 = vmatprep.subr.bf16.mxu0 %v3144_v0 }
 0x51b   :  { %2732 = vmatmul.mubr.msk.bf16.vlgmr.msra.gmra.mxu0 %vm293_vm2, %v504_v5  ;;  %v828_v5 = vpop.permute.xlu0 %827 }
 0x51c   :  { %2742 = vmatpush3.bf16.xpose.msra.mxu0 %v885_v52  ;;  %2743 = vmatprep.mubr.msk.bf16.mxu0 %vm3145_vm0, %v3144_v0 }
 0x51d   :  { %2753 = vmatprep.subr.bf16.mxu0 %v3144_v0 }
 0x523   :  { %2744 = vmatmul.mubr.msk.bf16.vlgmr.msra.gmra.mxu0 %vm293_vm2, %v878_v53 }
 0x524   :  { %2755 = vmatprep.mubr.msk.bf16.mxu0 %vm3145_vm0, %v3144_v0 }
 0x5cf   :  { %v672_v57 = vpop.f32.mrf.mxu1 }
 0x5d1   :  { %v2715_v58 = vpop.f32.mrf.mxu1 }
 0x5d2   :  { %v1048_v58 = vld [vmem:[#allocation10 + $0x4] sm:$0x3] }
 0x5d3   :  { %v675_v59 = vpop.f32.mrf.mxu1  ;;  %v720_v60 = vpop.f32.mrf.mxu0 }
 0x5d4   :  { %v726_v61 = vpack.c.bf16 %v720_v60, %v672_v57  ;;  %v1053_v59 = vsel %vm735_vm5, %v1048_v58, 0 }
 0x5d5   :  { %v2716_v62 = vpop.f32.mrf.mxu1  ;;  %v2721_v63 = vpop.f32.mrf.mxu0 }
 0x5d6   :  { %2726 = vmatmul.mubr.msk.bf16.vlgmr.msra.gmra.mxu1 %vm293_vm2, %v726_v61 }
 0x5d7   :  { %2736 = vmatpush3.bf16.xpose.msra.mxu1 %v835_v1  ;;  %v723_v2 = vpop.f32.mrf.mxu0  ;;  %2737 = vmatprep.mubr.msk.bf16.mxu1 %vm3145_vm0, %v3144_v0 }
 0x5d8   :  { %2747 = vmatprep.subr.bf16.mxu1 %v3144_v0 }
 0x5d9   :  { %v2722_v3 = vpop.f32.mrf.mxu0 }
 0x5db   :  { %v3354_v4 = vpop.f32.mrf.mxu0 }
 0x5dd   :  { %v2733_v6 = vpop.f32.mrf.mxu0 }
 0x5de   :  { %2738 = vmatmul.mubr.msk.bf16.vlgmr.msra.gmra.mxu1 %vm293_vm2, %v828_v5 }
 0x5df   :  { %v3357_v7 = vpop.f32.mrf.mxu0  ;;  %2749 = vmatprep.mubr.msk.bf16.mxu1 %vm3145_vm0, %v3144_v0 }
 0x5e1   :  { %v2734_v8 = vpop.f32.mrf.mxu0 }
 0x5e3   :  { %v921_v10 = vpop.f32.mrf.mxu0 }
 0x5e4   :  { %v930_v11 = vsel %vm386_vm4, %v921_v10, -inf }
 0x5e5   :  { %931 = vmax.xlane.f32.xlu1 %v930_v11  ;;  %v2745_v12 = vpop.f32.mrf.mxu0 }
 0x5e7   :  { %v924_v13 = vpop.f32.mrf.mxu0 }
 0x5e9   :  { %v2746_v14 = vpop.f32.mrf.mxu0 }
 0x5f6   :  { %999 = vrot.lane.b32.xlu1 %v3268_v27, %s3147_s4 }
 0x5fa   :  { %1100 = vrot.lane.b32.xlu1 %v3242_v9, %s3148_s21 }
 0x5fe   :  { %1150 = vrot.lane.b32.xlu1 %v3246_v15, %s3148_s21 }
 0x602   :  { %1148 = vrot.lane.b32.xlu1 %v3260_v24, %s3148_s21 }
 0x66e   :  { %v932_v16 = vpop.xlane.xlu1 %931 }
 0x66f   :  { %v934_v20 = vsub.f32 %v921_v10, %v932_v16 }
 0x671   :  { %v937_v21 = vmul.f32 1.442695, %v934_v20 }
 0x672   :  { %v1000_v17 = vpop.permute.xlu1 %999 }
 0x673   :  { %v1005_v19 = vsel %vm414_vm3, %v1000_v17, 0  ;;  %2961 = vpow2.f32 %v937_v21 }
 0x674   :  { %2754 = vmatpush3.bf16.msra.mxu0 %v1005_v19 }
 0x675   :  { %2765 = vmatprep.subr.bf16.mxu0 %v3144_v0 }
 0x676   :  { %v1101_v44 = vpop.permute.xlu1 %1100 }
 0x677   :  { %v1106_v46 = vsel %vm293_vm2, %v1101_v44, 0 }
 0x67a   :  { %v1151_v2 = vpop.permute.xlu1 %1150 }
 0x67b   :  { %v1156_v8 = vsel %vm293_vm2, %v1151_v2, 0 }
 0x67e   :  { %v1149_v12 = vpop.permute.xlu1 %1148 }
 0x680   :  { %v2962_v31 = vpop.eup %2961 }
 0x681   :  { %v942_v34 = vsel %vm386_vm4, %v2962_v31, 0.0 }
 0x696   :  { %v3372_v22 = vpop.f32.mrf.mxu1 }
 0x697   :  { %v821_v20 = vadd.f32 %v3354_v4, %v3372_v22 }
 0x698   :  { %v2727_v23 = vpop.f32.mrf.mxu1 }
 0x69a   :  { %v3374_v25 = vpop.f32.mrf.mxu1 }
 0x69c   :  { %v2728_v28 = vpop.f32.mrf.mxu1 }
 0x69e   :  { %v871_v29 = vpop.f32.mrf.mxu1 }
 0x69f   :  { %v927_v30 = vsel %vm386_vm4, %v871_v29, -inf }
 0x6a0   :  { %928 = vmax.xlane.f32.xlu0 %v927_v30  ;;  %v2739_v32 = vpop.f32.mrf.mxu1 }
 0x6a2   :  { %v874_v33 = vpop.f32.mrf.mxu1 }
 0x6a4   :  { %v2740_v35 = vpop.f32.mrf.mxu1  ;;  %943 = vadd.xlane.f32.xlu0 %v942_v34 }
 0x729   :  { %v929_v36 = vpop.xlane.xlu0 %928 }
 0x72a   :  { %v933_v37 = vsub.f32 %v871_v29, %v929_v36  ;;  %v824_v29 = vadd.f32 %v3357_v7, %v3374_v25 }
 0x72c   :  { %v935_v38 = vmul.f32 1.442695, %v933_v37 }
 0x72d   :  { %v944_v39 = vpop.xlane.xlu0 %943 }
 0x72e   :  { %2963 = vpow2.f32 %v935_v38 }
 0x72f   :  { %2965 = vrcp.f32 %v944_v39 }
 0x73b   :  { %v2964_v40 = vpop.eup %2963 }
 0x73c   :  { %v2966_v41 = vpop.eup %2965  ;;  %v939_v42 = vsel %vm386_vm4, %v2964_v40, 0.0 }
 0x73d   :  { %940 = vadd.xlane.f32.xlu0 %v939_v42  ;;  %v948_v43 = vmul.f32 %v2966_v41, %v2962_v31 }
 0x73f   :  { %v950_v45 = vpack.c.bf16 %v948_v43, %v948_v43 }
 0x741   :  { %2756 = vmatmul.mubr.msk.bf16.vlgmr.msra.gmra.mxu0 %vm386_vm4, %v950_v45 }
 0x742   :  { %2766 = vmatpush3.bf16.xpose.msra.mxu0 %v1106_v46  ;;  %2767 = vmatprep.mubr.msk.bf16.mxu0 %vm3145_vm0, %v3144_v0 }
 0x743   :  { %2777 = vmatprep.subr.bf16.mxu0 %v3144_v0 }
 0x753   :  { %951 = vrot.lane.b32.xlu0 %v3266_v26, %s3147_s4 }
 0x757   :  { %1098 = vrot.lane.b32.xlu0 %v3249_v18, %s3148_s21 }
 0x7c6   :  { %v941_v47 = vpop.xlane.xlu0 %940 }
 0x7c7   :  { %2967 = vrcp.f32 %v941_v47 }
 0x7ca   :  { %v952_v48 = vpop.permute.xlu0 %951 }
 0x7cb   :  { %v957_v49 = vsel %vm414_vm3, %v952_v48, 0 }
 0x7cc   :  { %2748 = vmatpush3.bf16.msra.mxu1 %v957_v49 }
 0x7cd   :  { %2759 = vmatprep.subr.bf16.mxu1 %v3144_v0 }
 0x7ce   :  { %v1099_v50 = vpop.permute.xlu0 %1098 }
 0x7cf   :  { %2768 = vmatmul.mubr.msk.bf16.vlgmr.msra.gmra.mxu0 %vm293_vm2, %v1099_v50 }
 0x7d0   :  { %2779 = vmatprep.mubr.msk.bf16.mxu0 %vm3145_vm0, %v3144_v0 }
 0x7d4   :  { %v2968_v51 = vpop.eup %2967 }
 0x7d5   :  { %v947_v52 = vmul.f32 %v2968_v51, %v2964_v40 }
 0x7d7   :  { %v949_v53 = vpack.c.bf16 %v947_v52, %v947_v52 }
 0x7d9   :  { %2750 = vmatmul.mubr.msk.bf16.vlgmr.msra.gmra.mxu1 %vm386_vm4, %v949_v53 }
 0x7da   :  { %2761 = vmatprep.mubr.msk.bf16.mxu1 %vm3145_vm0, %v3144_v0  ;;  %2760 = vmatpush3.bf16.msra.mxu1 %v1053_v59 }
 0x7db   :  { %2771 = vmatprep.subr.bf16.mxu1 %v3144_v0 }
 0x801   :  { %v1041_v54 = vpop.f32.mrf.mxu0 }
 0x803   :  { %v2757_v55 = vpop.f32.mrf.mxu0 }
 0x805   :  { %v1044_v56 = vpop.f32.mrf.mxu0 }
 0x807   :  { %v2758_v57 = vpop.f32.mrf.mxu0 }
 0x88f   :  { %v1142_v60 = vpop.f32.mrf.mxu0 }
 0x890   :  { %v1198_v61 = vsel %vm386_vm4, %v1142_v60, -inf }
 0x891   :  { %1199 = vmax.xlane.f32.xlu0 %v1198_v61  ;;  %v2769_v62 = vpop.f32.mrf.mxu0 }
 0x893   :  { %v1145_v63 = vpop.f32.mrf.mxu0 }
 0x895   :  { %v2770_v1 = vpop.f32.mrf.mxu0 }
 0x899   :  { %v993_v3 = vpop.f32.mrf.mxu1 }
 0x89a   :  { %v1047_v5 = vpack.c.bf16 %v1041_v54, %v993_v3  ;;  %v2942_v54 = vld [vmem:[#allocation10 + $0x4] ss:$0 sps:$4 sm:$0xcc]  }
 0x89b   :  { %v2751_v6 = vpop.f32.mrf.mxu1  ;;  %v1323_v55 = vrot.slane %v2942_v54, 2 }
 0x89c   :  { %2762 = vmatmul.mubr.msk.bf16.vlgmr.msra.gmra.mxu1 %vm293_vm2, %v1047_v5 }
 0x89d   :  { %2772 = vmatpush3.bf16.xpose.msra.mxu1 %v1156_v8  ;;  %v996_v10 = vpop.f32.mrf.mxu1  ;;  %2773 = vmatprep.mubr.msk.bf16.mxu1 %vm3145_vm0, %v3144_v0  ;;  %v1328_v56 = vsel %vm735_vm5, %v1323_v55, 0 }
 0x89e   :  { %2783 = vmatprep.subr.bf16.mxu1 %v3144_v0 }
 0x89f   :  { %v2752_v11 = vpop.f32.mrf.mxu1 }
 0x8a4   :  { %2774 = vmatmul.mubr.msk.bf16.vlgmr.msra.gmra.mxu1 %vm293_vm2, %v1149_v12 }
 0x8a5   :  { %2785 = vmatprep.mubr.msk.bf16.mxu1 %vm3145_vm0, %v3144_v0 }
 0x91a   :  { %v1200_v13 = vpop.xlane.xlu0 %1199 }
 0x91b   :  { %v1204_v14 = vsub.f32 %v1142_v60, %v1200_v13 }
 0x91d   :  { %v1206_v16 = vmul.f32 1.442695, %v1204_v14 }
 0x91f   :  { %2969 = vpow2.f32 %v1206_v16 }
 0x92c   :  { %v2970_v17 = vpop.eup %2969 }
 0x92d   :  { %v1210_v19 = vsel %vm386_vm4, %v2970_v17, 0.0 }
 0x92e   :  { %1211 = vadd.xlane.f32.xlu0 %v1210_v19 }
 0x95c   :  { %v1089_v21 = vpop.f32.mrf.mxu1 }
 0x95d   :  { %v3410_v23 = vadd.f32 %v1089_v21, %v821_v20 }
 0x95e   :  { %v2763_v28 = vpop.f32.mrf.mxu1 }
 0x960   :  { %v1092_v30 = vpop.f32.mrf.mxu1 }
 0x961   :  { %v3414_v31 = vadd.f32 %v1092_v30, %v824_v29 }
 0x962   :  { %v2764_v32 = vpop.f32.mrf.mxu1 }
 0x964   :  { %v1192_v33 = vpop.f32.mrf.mxu1 }
 0x965   :  { %v1201_v34 = vsel %vm386_vm4, %v1192_v33, -inf }
 0x966   :  { %1202 = vmax.xlane.f32.xlu1 %v1201_v34  ;;  %v2775_v35 = vpop.f32.mrf.mxu1 }
 0x968   :  { %v1195_v36 = vpop.f32.mrf.mxu1 }
 0x96a   :  { %v2776_v37 = vpop.f32.mrf.mxu1 }
 0x977   :  { %1270 = vrot.lane.b32.xlu1 %v3268_v27, %s3148_s21 }
 0x97b   :  { %1375 = vrot.lane.b32.xlu1 %v3242_v9, %s3149_s22 }
 0x97f   :  { %1425 = vrot.lane.b32.xlu1 %v3246_v15, %s3149_s22 }
 0x983   :  { %1423 = vrot.lane.b32.xlu1 %v3260_v24, %s3149_s22 }
 0x9b7   :  { %v1212_v41 = vpop.xlane.xlu0 %1211 }
 0x9ef   :  { %v1203_v4 = vpop.xlane.xlu1 %1202 }
 0x9f0   :  { %v1205_v7 = vsub.f32 %v1192_v33, %v1203_v4 }
 0x9f2   :  { %v1208_v22 = vmul.f32 1.442695, %v1205_v7 }
 0x9f3   :  { %v1271_v25 = vpop.permute.xlu1 %1270 }
 0x9f4   :  { %2971 = vpow2.f32 %v1208_v22  ;;  %v1276_v38 = vsel %vm414_vm3, %v1271_v25, 0 }
 0x9f5   :  { %2784 = vmatpush3.bf16.msra.mxu1 %v1276_v38  ;;  %2973 = vrcp.f32 %v1212_v41 }
 0x9f6   :  { %2795 = vmatprep.subr.bf16.mxu1 %v3144_v0 }
 0x9f7   :  { %v1376_v50 = vpop.permute.xlu1 %1375 }
 0x9f8   :  { %v1381_v52 = vsel %vm293_vm2, %v1376_v50, 0 }
 0x9fb   :  { %v1426_v61 = vpop.permute.xlu1 %1425 }
 0x9fc   :  { %v1431_v2 = vsel %vm293_vm2, %v1426_v61, 0 }
 0x9ff   :  { %v1424_v10 = vpop.permute.xlu1 %1423 }
 0xa01   :  { %v2972_v39 = vpop.eup %2971 }
 0xa02   :  { %v1213_v40 = vsel %vm386_vm4, %v2972_v39, 0.0  ;;  %v2974_v42 = vpop.eup %2973 }
 0xa03   :  { %1214 = vadd.xlane.f32.xlu0 %v1213_v40  ;;  %v1218_v44 = vmul.f32 %v2974_v42, %v2970_v17 }
 0xa05   :  { %v1220_v47 = vpack.c.bf16 %v1218_v44, %v1218_v44 }
 0xa19   :  { %1222 = vrot.lane.b32.xlu0 %v3266_v26, %s3148_s21 }
 0xa1d   :  { %1373 = vrot.lane.b32.xlu0 %v3249_v18, %s3149_s22 }
 0xa8c   :  { %v1215_v43 = vpop.xlane.xlu0 %1214 }
 0xa8d   :  { %2975 = vrcp.f32 %v1215_v43 }
 0xa90   :  { %v1223_v45 = vpop.permute.xlu0 %1222 }
 0xa91   :  { %v1228_v46 = vsel %vm414_vm3, %v1223_v45, 0 }
 0xa92   :  { %2778 = vmatpush3.bf16.msra.mxu0 %v1228_v46 }
 0xa93   :  { %2789 = vmatprep.subr.bf16.mxu0 %v3144_v0 }
 0xa94   :  { %v1374_v53 = vpop.permute.xlu0 %1373 }
 0xa95   :  { %2780 = vmatmul.mubr.msk.bf16.vlgmr.msra.gmra.mxu0 %vm386_vm4, %v1220_v47 }
 0xa96   :  { %2791 = vmatprep.mubr.msk.bf16.mxu0 %vm3145_vm0, %v3144_v0  ;;  %2790 = vmatpush3.bf16.msra.mxu0 %v1328_v56 }
 0xa97   :  { %2801 = vmatprep.subr.bf16.mxu0 %v3144_v0 }
 0xa9a   :  { %v2976_v48 = vpop.eup %2975 }
 0xa9b   :  { %v1219_v49 = vmul.f32 %v2976_v48, %v2972_v39 }
 0xa9d   :  { %v1221_v51 = vpack.c.bf16 %v1219_v49, %v1219_v49 }
 0xa9f   :  { %2786 = vmatmul.mubr.msk.bf16.vlgmr.msra.gmra.mxu1 %vm386_vm4, %v1221_v51 }
 0xaa0   :  { %2796 = vmatpush3.bf16.xpose.msra.mxu1 %v1381_v52  ;;  %2797 = vmatprep.mubr.msk.bf16.mxu1 %vm3145_vm0, %v3144_v0 }
 0xaa1   :  { %2807 = vmatprep.subr.bf16.mxu1 %v3144_v0 }
 0xaa7   :  { %2798 = vmatmul.mubr.msk.bf16.vlgmr.msra.gmra.mxu1 %vm293_vm2, %v1374_v53  ;;  %v1594_v53 = vld [vmem:[#allocation10 + $0x8] sm:$0x3] }
 0xaa8   :  { %2809 = vmatprep.mubr.msk.bf16.mxu1 %vm3145_vm0, %v3144_v0  ;;  %v1599_v54 = vsel %vm735_vm5, %v1594_v53, 0 }
 0xb55   :  { %v1264_v57 = vpop.f32.mrf.mxu0 }
 0xb57   :  { %v2781_v58 = vpop.f32.mrf.mxu0 }
 0xb59   :  { %v1267_v59 = vpop.f32.mrf.mxu0 }
 0xb5b   :  { %v2782_v60 = vpop.f32.mrf.mxu0 }
 0xb5f   :  { %v1312_v62 = vpop.f32.mrf.mxu1 }
 0xb60   :  { %v1318_v63 = vpack.c.bf16 %v1312_v62, %v1264_v57 }
 0xb61   :  { %v2787_v1 = vpop.f32.mrf.mxu1 }
 0xb62   :  { %2792 = vmatmul.mubr.msk.bf16.vlgmr.msra.gmra.mxu0 %vm293_vm2, %v1318_v63 }
 0xb63   :  { %2802 = vmatpush3.bf16.xpose.msra.mxu0 %v1431_v2  ;;  %v1315_v3 = vpop.f32.mrf.mxu1  ;;  %2803 = vmatprep.mubr.msk.bf16.mxu0 %vm3145_vm0, %v3144_v0 }
 0xb64   :  { %2813 = vmatprep.subr.bf16.mxu0 %v3144_v0 }
 0xb65   :  { %v2788_v5 = vpop.f32.mrf.mxu1 }
 0xb67   :  { %v1417_v6 = vpop.f32.mrf.mxu1 }
 0xb68   :  { %v1473_v8 = vsel %vm386_vm4, %v1417_v6, -inf }
 0xb69   :  { %1474 = vmax.xlane.f32.xlu0 %v1473_v8  ;;  %v2799_v11 = vpop.f32.mrf.mxu1 }
 0xb6a   :  { %2804 = vmatmul.mubr.msk.bf16.vlgmr.msra.gmra.mxu0 %vm293_vm2, %v1424_v10 }
 0xb6b   :  { %v1420_v12 = vpop.f32.mrf.mxu1  ;;  %2815 = vmatprep.mubr.msk.bf16.mxu0 %vm3145_vm0, %v3144_v0 }
 0xb6d   :  { %v2800_v13 = vpop.f32.mrf.mxu1 }
 0xbf2   :  { %v1475_v14 = vpop.xlane.xlu0 %1474 }
 0xbf3   :  { %v1479_v16 = vsub.f32 %v1417_v6, %v1475_v14 }
 0xbf5   :  { %v1481_v17 = vmul.f32 1.442695, %v1479_v16 }
 0xbf7   :  { %2977 = vpow2.f32 %v1481_v17 }
 0xc04   :  { %v2978_v19 = vpop.eup %2977 }
 0xc05   :  { %v1485_v20 = vsel %vm386_vm4, %v2978_v19, 0.0 }
 0xc06   :  { %1486 = vadd.xlane.f32.xlu0 %v1485_v20 }
 0xc22   :  { %v1364_v21 = vpop.f32.mrf.mxu0 }
 0xc23   :  { %v3458_v28 = vadd.f32 %v1364_v21, %v3410_v23 }
 0xc24   :  { %v2793_v29 = vpop.f32.mrf.mxu0 }
 0xc26   :  { %v1367_v30 = vpop.f32.mrf.mxu0 }
 0xc27   :  { %v3461_v32 = vadd.f32 %v1367_v30, %v3414_v31 }
 0xc28   :  { %v2794_v33 = vpop.f32.mrf.mxu0 }
 0xc2a   :  { %v1467_v34 = vpop.f32.mrf.mxu0 }
 0xc2b   :  { %v1476_v35 = vsel %vm386_vm4, %v1467_v34, -inf }
 0xc2c   :  { %1477 = vmax.xlane.f32.xlu1 %v1476_v35  ;;  %v2805_v36 = vpop.f32.mrf.mxu0 }
 0xc2e   :  { %v1470_v37 = vpop.f32.mrf.mxu0 }
 0xc30   :  { %v2806_v4 = vpop.f32.mrf.mxu0 }
 0xc3d   :  { %1545 = vrot.lane.b32.xlu1 %v3268_v27, %s3149_s22 }
 0xc41   :  { %1646 = vrot.lane.b32.xlu1 %v3242_v9, %s3150_s23 }
 0xc45   :  { %1696 = vrot.lane.b32.xlu1 %v3246_v15, %s3150_s23 }
 0xc49   :  { %1694 = vrot.lane.b32.xlu1 %v3260_v24, %s3150_s23 }
 0xc8f   :  { %v1487_v40 = vpop.xlane.xlu0 %1486 }
 0xcb5   :  { %v1478_v23 = vpop.xlane.xlu1 %1477 }
 0xcb6   :  { %v1480_v31 = vsub.f32 %v1467_v34, %v1478_v23 }
 0xcb8   :  { %v1483_v7 = vmul.f32 1.442695, %v1480_v31 }
 0xcb9   :  { %v1546_v22 = vpop.permute.xlu1 %1545 }
 0xcba   :  { %2979 = vpow2.f32 %v1483_v7  ;;  %v1551_v25 = vsel %vm414_vm3, %v1546_v22, 0 }
 0xcbb   :  { %2814 = vmatpush3.bf16.msra.mxu0 %v1551_v25  ;;  %2981 = vrcp.f32 %v1487_v40 }
 0xcbc   :  { %2825 = vmatprep.subr.bf16.mxu0 %v3144_v0 }
 0xcbd   :  { %v1647_v49 = vpop.permute.xlu1 %1646 }
 0xcbe   :  { %v1652_v51 = vsel %vm293_vm2, %v1647_v49, 0 }
 0xcc1   :  { %v1697_v59 = vpop.permute.xlu1 %1696 }
 0xcc2   :  { %v1702_v63 = vsel %vm293_vm2, %v1697_v59, 0 }
 0xcc5   :  { %v1695_v6 = vpop.permute.xlu1 %1694 }
 0xcc7   :  { %v2980_v38 = vpop.eup %2979 }
 0xcc8   :  { %v1488_v39 = vsel %vm386_vm4, %v2980_v38, 0.0  ;;  %v2982_v41 = vpop.eup %2981 }
 0xcc9   :  { %1489 = vadd.xlane.f32.xlu0 %v1488_v39  ;;  %v1493_v43 = vmul.f32 %v2982_v41, %v2978_v19 }
 0xccb   :  { %v1495_v46 = vpack.c.bf16 %v1493_v43, %v1493_v43 }
 0xcdf   :  { %1497 = vrot.lane.b32.xlu0 %v3266_v26, %s3149_s22 }
 0xce3   :  { %1644 = vrot.lane.b32.xlu0 %v3249_v18, %s3150_s23 }
 0xd52   :  { %v1490_v42 = vpop.xlane.xlu0 %1489 }
 0xd53   :  { %2983 = vrcp.f32 %v1490_v42 }
 0xd56   :  { %v1498_v44 = vpop.permute.xlu0 %1497 }
 0xd57   :  { %v1503_v45 = vsel %vm414_vm3, %v1498_v44, 0 }
 0xd58   :  { %2808 = vmatpush3.bf16.msra.mxu1 %v1503_v45 }
 0xd59   :  { %2819 = vmatprep.subr.bf16.mxu1 %v3144_v0 }
 0xd5a   :  { %v1645_v52 = vpop.permute.xlu0 %1644 }
 0xd5b   :  { %2810 = vmatmul.mubr.msk.bf16.vlgmr.msra.gmra.mxu1 %vm386_vm4, %v1495_v46 }
 0xd5c   :  { %2821 = vmatprep.mubr.msk.bf16.mxu1 %vm3145_vm0, %v3144_v0  ;;  %2820 = vmatpush3.bf16.msra.mxu1 %v1599_v54 }
 0xd5d   :  { %2831 = vmatprep.subr.bf16.mxu1 %v3144_v0 }
 0xd60   :  { %v2984_v47 = vpop.eup %2983 }
 0xd61   :  { %v1494_v48 = vmul.f32 %v2984_v47, %v2980_v38 }
 0xd63   :  { %v1496_v50 = vpack.c.bf16 %v1494_v48, %v1494_v48 }
 0xd65   :  { %2816 = vmatmul.mubr.msk.bf16.vlgmr.msra.gmra.mxu0 %vm386_vm4, %v1496_v50 }
 0xd66   :  { %2826 = vmatpush3.bf16.xpose.msra.mxu0 %v1652_v51  ;;  %2827 = vmatprep.mubr.msk.bf16.mxu0 %vm3145_vm0, %v3144_v0  ;;  %v2943_v51 = vld [vmem:[#allocation10 + $0x8] ss:$0 sps:$4 sm:$0xcc]  }
 0xd67   :  { %2837 = vmatprep.subr.bf16.mxu0 %v3144_v0 }
 0xd6d   :  { %2828 = vmatmul.mubr.msk.bf16.vlgmr.msra.gmra.mxu0 %vm293_vm2, %v1645_v52  ;;  %v1869_v52 = vrot.slane %v2943_v51, 2 }
 0xd6e   :  { %2839 = vmatprep.mubr.msk.bf16.mxu0 %vm3145_vm0, %v3144_v0 }
 0xd6f   :  { %v1874_v53 = vsel %vm735_vm5, %v1869_v52, 0 }
 0xe1b   :  { %v1539_v55 = vpop.f32.mrf.mxu1 }
 0xe1d   :  { %v2811_v56 = vpop.f32.mrf.mxu1 }
 0xe1f   :  { %v1542_v57 = vpop.f32.mrf.mxu1 }
 0xe21   :  { %v2812_v58 = vpop.f32.mrf.mxu1 }
 0xe25   :  { %v1587_v60 = vpop.f32.mrf.mxu0 }
 0xe26   :  { %v1593_v61 = vpack.c.bf16 %v1587_v60, %v1539_v55 }
 0xe27   :  { %v2817_v62 = vpop.f32.mrf.mxu0 }
 0xe28   :  { %2822 = vmatmul.mubr.msk.bf16.vlgmr.msra.gmra.mxu1 %vm293_vm2, %v1593_v61 }
 0xe29   :  { %2832 = vmatpush3.bf16.xpose.msra.mxu1 %v1702_v63  ;;  %v1590_v1 = vpop.f32.mrf.mxu0  ;;  %2833 = vmatprep.mubr.msk.bf16.mxu1 %vm3145_vm0, %v3144_v0 }
 0xe2a   :  { %2843 = vmatprep.subr.bf16.mxu1 %v3144_v0 }
 0xe2b   :  { %v2818_v2 = vpop.f32.mrf.mxu0 }
 0xe2d   :  { %v1688_v3 = vpop.f32.mrf.mxu0 }
 0xe2e   :  { %v1744_v5 = vsel %vm386_vm4, %v1688_v3, -inf }
 0xe2f   :  { %1745 = vmax.xlane.f32.xlu0 %v1744_v5  ;;  %v2829_v8 = vpop.f32.mrf.mxu0 }
 0xe30   :  { %2834 = vmatmul.mubr.msk.bf16.vlgmr.msra.gmra.mxu1 %vm293_vm2, %v1695_v6 }
 0xe31   :  { %v1691_v10 = vpop.f32.mrf.mxu0  ;;  %2845 = vmatprep.mubr.msk.bf16.mxu1 %vm3145_vm0, %v3144_v0 }
 0xe33   :  { %v2830_v11 = vpop.f32.mrf.mxu0 }
 0xeb8   :  { %v1746_v12 = vpop.xlane.xlu0 %1745 }
 0xeb9   :  { %v1750_v13 = vsub.f32 %v1688_v3, %v1746_v12 }
 0xebb   :  { %v1752_v14 = vmul.f32 1.442695, %v1750_v13 }
 0xebd   :  { %2985 = vpow2.f32 %v1752_v14 }
 0xeca   :  { %v2986_v16 = vpop.eup %2985 }
 0xecb   :  { %v1756_v17 = vsel %vm386_vm4, %v2986_v16, 0.0 }
 0xecc   :  { %1757 = vadd.xlane.f32.xlu0 %v1756_v17 }
 0xee8   :  { %v1635_v19 = vpop.f32.mrf.mxu1 }
 0xee9   :  { %v3505_v20 = vadd.f32 %v1635_v19, %v3458_v28 }
 0xeea   :  { %v2823_v21 = vpop.f32.mrf.mxu1 }
 0xeec   :  { %v1638_v29 = vpop.f32.mrf.mxu1 }
 0xeed   :  { %v3508_v30 = vadd.f32 %v1638_v29, %v3461_v32 }
 0xeee   :  { %v2824_v33 = vpop.f32.mrf.mxu1 }
 0xef0   :  { %v1738_v34 = vpop.f32.mrf.mxu1 }
 0xef1   :  { %v1747_v35 = vsel %vm386_vm4, %v1738_v34, -inf }
 0xef2   :  { %1748 = vmax.xlane.f32.xlu1 %v1747_v35  ;;  %v2835_v36 = vpop.f32.mrf.mxu1 }
 0xef4   :  { %v1741_v37 = vpop.f32.mrf.mxu1 }
 0xef6   :  { %v2836_v4 = vpop.f32.mrf.mxu1 }
 0xf03   :  { %1816 = vrot.lane.b32.xlu1 %v3268_v27, %s3150_s23 }
 0xf07   :  { %1921 = vrot.lane.b32.xlu1 %v3242_v9, %s3151_s24 }
 0xf0b   :  { %1971 = vrot.lane.b32.xlu1 %v3246_v15, %s3151_s24 }
 0xf0f   :  { %1969 = vrot.lane.b32.xlu1 %v3260_v24, %s3151_s24 }
 0xf55   :  { %v1758_v38 = vpop.xlane.xlu0 %1757 }
 0xf7b   :  { %v1749_v28 = vpop.xlane.xlu1 %1748 }
 0xf7c   :  { %v1751_v32 = vsub.f32 %v1738_v34, %v1749_v28 }
 0xf7e   :  { %v1754_v23 = vmul.f32 1.442695, %v1751_v32 }
 0xf7f   :  { %v1817_v31 = vpop.permute.xlu1 %1816 }
 0xf80   :  { %2987 = vpow2.f32 %v1754_v23  ;;  %v1822_v7 = vsel %vm414_vm3, %v1817_v31, 0 }
 0xf81   :  { %2844 = vmatpush3.bf16.msra.mxu1 %v1822_v7  ;;  %2989 = vrcp.f32 %v1758_v38 }
 0xf82   :  { %2855 = vmatprep.subr.bf16.mxu1 %v3144_v0 }
 0xf83   :  { %v1922_v47 = vpop.permute.xlu1 %1921 }
 0xf84   :  { %v1927_v49 = vsel %vm293_vm2, %v1922_v47, 0 }
 0xf87   :  { %v1972_v58 = vpop.permute.xlu1 %1971 }
 0xf88   :  { %v1977_v62 = vsel %vm293_vm2, %v1972_v58, 0 }
 0xf8b   :  { %v1970_v5 = vpop.permute.xlu1 %1969 }
 0xf8d   :  { %v2988_v22 = vpop.eup %2987 }
 0xf8e   :  { %v1759_v25 = vsel %vm386_vm4, %v2988_v22, 0.0  ;;  %v2990_v39 = vpop.eup %2989 }
 0xf8f   :  { %1760 = vadd.xlane.f32.xlu0 %v1759_v25  ;;  %v1764_v41 = vmul.f32 %v2990_v39, %v2986_v16 }
 0xf91   :  { %v1766_v44 = vpack.c.bf16 %v1764_v41, %v1764_v41 }
 0xfa5   :  { %1768 = vrot.lane.b32.xlu0 %v3266_v26, %s3150_s23 }
 0xfa9   :  { %1919 = vrot.lane.b32.xlu0 %v3249_v18, %s3151_s24 }
0x1018   :  { %v1761_v40 = vpop.xlane.xlu0 %1760 }
0x1019   :  { %2991 = vrcp.f32 %v1761_v40 }
0x101c   :  { %v1769_v42 = vpop.permute.xlu0 %1768 }
0x101d   :  { %v1774_v43 = vsel %vm414_vm3, %v1769_v42, 0 }
0x101e   :  { %2838 = vmatpush3.bf16.msra.mxu0 %v1774_v43 }
0x101f   :  { %2849 = vmatprep.subr.bf16.mxu0 %v3144_v0 }
0x1020   :  { %v1920_v50 = vpop.permute.xlu0 %1919 }
0x1021   :  { %2840 = vmatmul.mubr.msk.bf16.vlgmr.msra.gmra.mxu0 %vm386_vm4, %v1766_v44 }
0x1022   :  { %2851 = vmatprep.mubr.msk.bf16.mxu0 %vm3145_vm0, %v3144_v0  ;;  %2850 = vmatpush3.bf16.msra.mxu0 %v1874_v53 }
0x1023   :  { %2861 = vmatprep.subr.bf16.mxu0 %v3144_v0 }
0x1026   :  { %v2992_v45 = vpop.eup %2991 }
0x1027   :  { %v1765_v46 = vmul.f32 %v2992_v45, %v2988_v22 }
0x1029   :  { %v1767_v48 = vpack.c.bf16 %v1765_v46, %v1765_v46  ;;  %v2140_v46 = vld [vmem:[#allocation10 + $0xc] sm:$0x3] }
0x102a   :  { %v2145_v47 = vsel %vm735_vm5, %v2140_v46, 0 }
0x102b   :  { %2846 = vmatmul.mubr.msk.bf16.vlgmr.msra.gmra.mxu1 %vm386_vm4, %v1767_v48 }
0x102c   :  { %2856 = vmatpush3.bf16.xpose.msra.mxu1 %v1927_v49  ;;  %2857 = vmatprep.mubr.msk.bf16.mxu1 %vm3145_vm0, %v3144_v0 }
0x102d   :  { %2867 = vmatprep.subr.bf16.mxu1 %v3144_v0 }
0x1033   :  { %2858 = vmatmul.mubr.msk.bf16.vlgmr.msra.gmra.mxu1 %vm293_vm2, %v1920_v50 }
0x1034   :  { %2869 = vmatprep.mubr.msk.bf16.mxu1 %vm3145_vm0, %v3144_v0 }
0x10e1   :  { %v1810_v54 = vpop.f32.mrf.mxu0 }
0x10e3   :  { %v2841_v55 = vpop.f32.mrf.mxu0 }
0x10e5   :  { %v1813_v56 = vpop.f32.mrf.mxu0 }
0x10e7   :  { %v2842_v57 = vpop.f32.mrf.mxu0 }
0x10eb   :  { %v1858_v59 = vpop.f32.mrf.mxu1 }
0x10ec   :  { %v1864_v60 = vpack.c.bf16 %v1858_v59, %v1810_v54 }
0x10ed   :  { %v2847_v61 = vpop.f32.mrf.mxu1 }
0x10ee   :  { %2852 = vmatmul.mubr.msk.bf16.vlgmr.msra.gmra.mxu0 %vm293_vm2, %v1864_v60 }
0x10ef   :  { %2862 = vmatpush3.bf16.xpose.msra.mxu0 %v1977_v62  ;;  %v1861_v63 = vpop.f32.mrf.mxu1  ;;  %2863 = vmatprep.mubr.msk.bf16.mxu0 %vm3145_vm0, %v3144_v0 }
0x10f0   :  { %2873 = vmatprep.subr.bf16.mxu0 %v3144_v0 }
0x10f1   :  { %v2848_v1 = vpop.f32.mrf.mxu1 }
0x10f3   :  { %v1963_v2 = vpop.f32.mrf.mxu1 }
0x10f4   :  { %v2019_v3 = vsel %vm386_vm4, %v1963_v2, -inf }
0x10f5   :  { %2020 = vmax.xlane.f32.xlu0 %v2019_v3  ;;  %v2859_v6 = vpop.f32.mrf.mxu1 }
0x10f6   :  { %2864 = vmatmul.mubr.msk.bf16.vlgmr.msra.gmra.mxu0 %vm293_vm2, %v1970_v5 }
0x10f7   :  { %v1966_v8 = vpop.f32.mrf.mxu1  ;;  %2875 = vmatprep.mubr.msk.bf16.mxu0 %vm3145_vm0, %v3144_v0 }
0x10f9   :  { %v2860_v10 = vpop.f32.mrf.mxu1 }
0x117e   :  { %v2021_v11 = vpop.xlane.xlu0 %2020 }
0x117f   :  { %v2025_v12 = vsub.f32 %v1963_v2, %v2021_v11 }
0x1181   :  { %v2027_v13 = vmul.f32 1.442695, %v2025_v12 }
0x1183   :  { %2993 = vpow2.f32 %v2027_v13 }
0x1190   :  { %v2994_v14 = vpop.eup %2993 }
0x1191   :  { %v2031_v16 = vsel %vm386_vm4, %v2994_v14, 0.0 }
0x1192   :  { %2032 = vadd.xlane.f32.xlu0 %v2031_v16 }
0x11ae   :  { %v1910_v17 = vpop.f32.mrf.mxu0 }
0x11af   :  { %v3552_v19 = vadd.f32 %v1910_v17, %v3505_v20 }
0x11b0   :  { %v2853_v21 = vpop.f32.mrf.mxu0 }
0x11b2   :  { %v1913_v29 = vpop.f32.mrf.mxu0 }
0x11b3   :  { %v3555_v33 = vadd.f32 %v1913_v29, %v3508_v30 }
0x11b4   :  { %v2854_v34 = vpop.f32.mrf.mxu0 }
0x11b6   :  { %v2013_v35 = vpop.f32.mrf.mxu0 }
0x11b7   :  { %v2022_v36 = vsel %vm386_vm4, %v2013_v35, -inf }
0x11b8   :  { %2023 = vmax.xlane.f32.xlu1 %v2022_v36  ;;  %v2865_v37 = vpop.f32.mrf.mxu0 }
0x11ba   :  { %v2016_v4 = vpop.f32.mrf.mxu0 }
0x11bc   :  { %v2866_v28 = vpop.f32.mrf.mxu0 }
0x11c9   :  { %2091 = vrot.lane.b32.xlu1 %v3268_v27, %s3151_s24 }
0x11cd   :  { %2192 = vrot.lane.b32.xlu1 %v3242_v9, %s3152_s25 }
0x11d1   :  { %2242 = vrot.lane.b32.xlu1 %v3246_v15, %s3152_s25 }
0x11d5   :  { %2240 = vrot.lane.b32.xlu1 %v3260_v24, %s3152_s25 }
0x121b   :  { %v2033_v9 = vpop.xlane.xlu0 %2032 }
0x1241   :  { %v2024_v20 = vpop.xlane.xlu1 %2023 }
0x1242   :  { %v2026_v30 = vsub.f32 %v2013_v35, %v2024_v20 }
0x1244   :  { %v2029_v32 = vmul.f32 1.442695, %v2026_v30 }
0x1245   :  { %v2092_v23 = vpop.permute.xlu1 %2091 }
0x1246   :  { %2995 = vpow2.f32 %v2029_v32  ;;  %v2097_v31 = vsel %vm414_vm3, %v2092_v23, 0 }
0x1247   :  { %2874 = vmatpush3.bf16.msra.mxu0 %v2097_v31  ;;  %2997 = vrcp.f32 %v2033_v9 }
0x1248   :  { %2885 = vmatprep.subr.bf16.mxu0 %v3144_v0 }
0x1249   :  { %v2193_v42 = vpop.permute.xlu1 %2192 }
0x124a   :  { %v2198_v44 = vsel %vm293_vm2, %v2193_v42, 0 }
0x124d   :  { %v2243_v52 = vpop.permute.xlu1 %2242 }
0x124e   :  { %v2248_v56 = vsel %vm293_vm2, %v2243_v52, 0 }
0x1251   :  { %v2241_v61 = vpop.permute.xlu1 %2240 }
0x1253   :  { %v2996_v7 = vpop.eup %2995 }
0x1254   :  { %v2034_v22 = vsel %vm386_vm4, %v2996_v7, 0.0  ;;  %v2998_v15 = vpop.eup %2997 }
0x1255   :  { %2035 = vadd.xlane.f32.xlu0 %v2034_v22  ;;  %v2039_v25 = vmul.f32 %v2998_v15, %v2994_v14 }
0x1257   :  { %v2041_v40 = vpack.c.bf16 %v2039_v25, %v2039_v25 }
0x126b   :  { %2043 = vrot.lane.b32.xlu0 %v3266_v26, %s3151_s24 }
0x126f   :  { %2190 = vrot.lane.b32.xlu0 %v3249_v18, %s3152_s25 }
0x12de   :  { %v2036_v24 = vpop.xlane.xlu0 %2035 }
0x12df   :  { %2999 = vrcp.f32 %v2036_v24  ;;  %v2944_v24 = vld [vmem:[#allocation10 + $0xc] ss:$0 sps:$4 sm:$0xcc]  }
0x12e0   :  { %v2415_v25 = vrot.slane %v2944_v24, 2 }
0x12e2   :  { %v2044_v38 = vpop.permute.xlu0 %2043 }
0x12e3   :  { %v2049_v39 = vsel %vm414_vm3, %v2044_v38, 0  ;;  %v2420_v38 = vsel %vm735_vm5, %v2415_v25, 0 }
0x12e4   :  { %2868 = vmatpush3.bf16.msra.mxu1 %v2049_v39 }
0x12e5   :  { %2879 = vmatprep.subr.bf16.mxu1 %v3144_v0 }
0x12e6   :  { %v2191_v45 = vpop.permute.xlu0 %2190 }
0x12e7   :  { %2870 = vmatmul.mubr.msk.bf16.vlgmr.msra.gmra.mxu1 %vm386_vm4, %v2041_v40 }
0x12e8   :  { %2881 = vmatprep.mubr.msk.bf16.mxu1 %vm3145_vm0, %v3144_v0  ;;  %2880 = vmatpush3.bf16.msra.mxu1 %v2145_v47  ;;  %v2555_v47 = vld [vmem:[%s3628_s5] ss:$0 sm:$0xff] }
0x12e9   :  { %2891 = vmatprep.subr.bf16.mxu1 %v3144_v0 }
0x12ec   :  { %v3000_v41 = vpop.eup %2999 }
0x12ed   :  { %v2040_v18 = vmul.f32 %v3000_v41, %v2996_v7 }
0x12ef   :  { %v2042_v43 = vpack.c.bf16 %v2040_v18, %v2040_v18 }
0x12f1   :  { %2876 = vmatmul.mubr.msk.bf16.vlgmr.msra.gmra.mxu0 %vm386_vm4, %v2042_v43 }
0x12f2   :  { %2886 = vmatpush3.bf16.xpose.msra.mxu0 %v2198_v44  ;;  %2887 = vmatprep.mubr.msk.bf16.mxu0 %vm3145_vm0, %v3144_v0 }
0x12f3   :  { %2897 = vmatprep.subr.bf16.mxu0 %v3144_v0 }
0x12f9   :  { %2888 = vmatmul.mubr.msk.bf16.vlgmr.msra.gmra.mxu0 %vm293_vm2, %v2191_v45 }
0x12fa   :  { %2899 = vmatprep.mubr.msk.bf16.mxu0 %vm3145_vm0, %v3144_v0 }
0x13a7   :  { %v2085_v48 = vpop.f32.mrf.mxu1 }
0x13a9   :  { %v2871_v49 = vpop.f32.mrf.mxu1 }
0x13ab   :  { %v2088_v50 = vpop.f32.mrf.mxu1 }
0x13ad   :  { %v2872_v51 = vpop.f32.mrf.mxu1 }
0x13b1   :  { %v2133_v53 = vpop.f32.mrf.mxu0 }
0x13b2   :  { %v2139_v54 = vpack.c.bf16 %v2133_v53, %v2085_v48 }
0x13b3   :  { %v2877_v55 = vpop.f32.mrf.mxu0 }
0x13b4   :  { %2882 = vmatmul.mubr.msk.bf16.vlgmr.msra.gmra.mxu1 %vm293_vm2, %v2139_v54 }
0x13b5   :  { %2892 = vmatpush3.bf16.xpose.msra.mxu1 %v2248_v56  ;;  %v2136_v57 = vpop.f32.mrf.mxu0  ;;  %2893 = vmatprep.mubr.msk.bf16.mxu1 %vm3145_vm0, %v3144_v0 }
0x13b6   :  { %2903 = vmatprep.subr.bf16.mxu1 %v3144_v0 }
0x13b7   :  { %v2878_v58 = vpop.f32.mrf.mxu0 }
0x13b9   :  { %v2234_v59 = vpop.f32.mrf.mxu0 }
0x13ba   :  { %v2290_v60 = vsel %vm386_vm4, %v2234_v59, -inf }
0x13bb   :  { %2291 = vmax.xlane.f32.xlu0 %v2290_v60  ;;  %v2889_v62 = vpop.f32.mrf.mxu0 }
0x13bc   :  { %2894 = vmatmul.mubr.msk.bf16.vlgmr.msra.gmra.mxu1 %vm293_vm2, %v2241_v61 }
0x13bd   :  { %v2237_v63 = vpop.f32.mrf.mxu0  ;;  %2905 = vmatprep.mubr.msk.bf16.mxu1 %vm3145_vm0, %v3144_v0 }
0x13bf   :  { %v2890_v1 = vpop.f32.mrf.mxu0 }
0x1444   :  { %v2292_v2 = vpop.xlane.xlu0 %2291 }
0x1445   :  { %v2296_v3 = vsub.f32 %v2234_v59, %v2292_v2 }
0x1447   :  { %v2298_v5 = vmul.f32 1.442695, %v2296_v3 }
0x1449   :  { %3001 = vpow2.f32 %v2298_v5 }
0x1456   :  { %v3002_v6 = vpop.eup %3001 }
0x1457   :  { %v2302_v8 = vsel %vm386_vm4, %v3002_v6, 0.0 }
0x1458   :  { %2303 = vadd.xlane.f32.xlu0 %v2302_v8 }
0x1474   :  { %v2181_v10 = vpop.f32.mrf.mxu1 }
0x1475   :  { %v2188_v11 = vadd.f32 %v2181_v10, %v3552_v19 }
0x1476   :  { %v2883_v12 = vpop.f32.mrf.mxu1 }
0x1478   :  { %v2184_v13 = vpop.f32.mrf.mxu1 }
0x1479   :  { %v2189_v14 = vadd.f32 %v2184_v13, %v3555_v33 }
0x147a   :  { %v2884_v16 = vpop.f32.mrf.mxu1 }
0x147c   :  { %v2284_v17 = vpop.f32.mrf.mxu1 }
0x147d   :  { %v2293_v21 = vsel %vm386_vm4, %v2284_v17, -inf }
0x147e   :  { %2294 = vmax.xlane.f32.xlu1 %v2293_v21  ;;  %v2895_v29 = vpop.f32.mrf.mxu1 }
0x1480   :  { %v2287_v34 = vpop.f32.mrf.mxu1 }
0x1482   :  { %v2896_v35 = vpop.f32.mrf.mxu1 }
0x148f   :  { %2362 = vrot.lane.b32.xlu1 %v3268_v27, %s3152_s25 }
0x14e1   :  { %v2304_v30 = vpop.xlane.xlu0 %2303 }
0x1507   :  { %v2295_v36 = vpop.xlane.xlu1 %2294 }
0x1508   :  { %v2297_v37 = vsub.f32 %v2284_v17, %v2295_v36 }
0x150a   :  { %v2300_v4 = vmul.f32 1.442695, %v2297_v37 }
0x150b   :  { %v2363_v28 = vpop.permute.xlu1 %2362 }
0x150c   :  { %3003 = vpow2.f32 %v2300_v4  ;;  %v2368_v19 = vsel %vm414_vm3, %v2363_v28, 0 }
0x150d   :  { %2904 = vmatpush3.bf16.msra.mxu1 %v2368_v19  ;;  %3005 = vrcp.f32 %v2304_v30 }
0x1519   :  { %v3004_v33 = vpop.eup %3003 }
0x151a   :  { %v2305_v20 = vsel %vm386_vm4, %v3004_v33, 0.0  ;;  %v3006_v32 = vpop.eup %3005 }
0x151b   :  { %2306 = vadd.xlane.f32.xlu0 %v2305_v20  ;;  %v2310_v27 = vmul.f32 %v3006_v32, %v3002_v6 }
0x151d   :  { %v2312_v22 = vpack.c.bf16 %v2310_v27, %v2310_v27 }
0x1531   :  { %2314 = vrot.lane.b32.xlu0 %v3266_v26, %s3152_s25 }
0x15a4   :  { %v2307_v23 = vpop.xlane.xlu0 %2306 }
0x15a5   :  { %3007 = vrcp.f32 %v2307_v23 }
0x15a8   :  { %v2315_v31 = vpop.permute.xlu0 %2314 }
0x15a9   :  { %v2320_v7 = vsel %vm414_vm3, %v2315_v31, 0 }
0x15aa   :  { %2898 = vmatpush3.bf16.msra.mxu0 %v2320_v7 }
0x15ab   :  { %2909 = vmatprep.subr.bf16.mxu0 %v3144_v0 }
0x15ad   :  { %2900 = vmatmul.mubr.msk.bf16.vlgmr.msra.gmra.mxu0 %vm386_vm4, %v2312_v22 }
0x15ae   :  { %2911 = vmatprep.mubr.msk.bf16.mxu0 %vm3145_vm0, %v3144_v0  ;;  %2910 = vmatpush3.bf16.msra.mxu0 %v2420_v38 }
0x15b2   :  { %v3008_v9 = vpop.eup %3007 }
0x15b3   :  { %v2311_v26 = vmul.f32 %v3008_v9, %v3004_v33 }
0x15b5   :  { %v2313_v15 = vpack.c.bf16 %v2311_v26, %v2311_v26 }
0x15b7   :  { %2906 = vmatmul.mubr.msk.bf16.vlgmr.msra.gmra.mxu1 %vm386_vm4, %v2313_v15 }
0x166d   :  { %v2356_v39 = vpop.f32.mrf.mxu0 }
0x166f   :  { %v2901_v40 = vpop.f32.mrf.mxu0 }
0x1671   :  { %v2359_v41 = vpop.f32.mrf.mxu0 }
0x1673   :  { %v2902_v18 = vpop.f32.mrf.mxu0 }
0x1677   :  { %v2404_v42 = vpop.f32.mrf.mxu1 }
0x1678   :  { %v2410_v43 = vpack.c.bf16 %v2404_v42, %v2356_v39 }
0x1679   :  { %v2907_v44 = vpop.f32.mrf.mxu1 }
0x167a   :  { %2912 = vmatmul.mubr.msk.bf16.vlgmr.msra.gmra.mxu0 %vm293_vm2, %v2410_v43 }
0x167b   :  { %v2407_v0 = vpop.f32.mrf.mxu1 }
0x167d   :  { %v2908_v45 = vpop.f32.mrf.mxu1 }
0x173a   :  { %v2456_v46 = vpop.f32.mrf.mxu0 }
0x173b   :  { %v2463_v48 = vadd.f32 %v2456_v46, %v2188_v11 }
0x173c   :  { %v2913_v49 = vpop.f32.mrf.mxu0 }
0x173d   :  { %v2472_v50 = vadd.f32 %v2555_v47, %v2463_v48 }
0x173e   :  { %v2459_v51 = vpop.f32.mrf.mxu0 }
0x173f   :  { %2474 = vst.msk [vmem:[#allocation11] sm:$0xff] %vm124_vm1, %v2472_v50  ;;  %v2464_v52 = vadd.f32 %v2459_v51, %v2189_v14 }
0x1740   :  { %v2914_v53 = vpop.f32.mrf.mxu0 }
0x1741   :  { %v2473_v54 = vadd.f32 %v2555_v47, %v2464_v52 }
0x1743   :  { %2475 = vst.msk [vmem:[#allocation11 + $0x8] sm:$0xff] %vm124_vm1, %v2473_v54 }
0x1744   :  { %3120 = shalt.err (!%p3117_p1)
}
0x1745   :  { %s3154_s5 = smov 128   ;;  %s3155_s7 = smov 8  }
0x1746   :  { %2487 = dma.vmem_to_hbm [thread:$0]  %s2482_s29, 256, %s3629_s6, [#allocation4], %s3154_s5, %s3154_s5, %s3155_s7  }
0x1747   :  { %3135 = dma.done.wait [#allocation4], 256  }
0x1748   :  { %3136 = vsyncadd [#allocation4], 4294967040 }
0x1749   :  { %2491 = vsyncpa [#allocation3], 1 }
0x174a   :  { %2492 = vsyncpa [#allocation6], 1 }
0x174b   :  { %2493 = vsyncpa [#allocation9], 1 }
0x174c   :  { %2494 = vsyncpa [#allocation4], 1 }

</bundles_post_ra>
